<compile_context>
chip_gen: v7x
topology: tpu7x:2x2x1
jax: 0.10.0
libtpu: 0.0.40
codegen_flags: <defaults>
</compile_context>

<pallas_src>
import numpy as np

import jax
import jax.numpy as jnp
from jax.experimental import pallas as pl
from jax.experimental.pallas import tpu as pltpu


# ----------------------------------------------------------------------------
# Model configuration (KeypointHead per cfg.MODEL.*)
# ----------------------------------------------------------------------------
IN_CH = 3
CIN_PAD = 8                  # stem1 contraction dim padded 3 -> 8
STEM1_CH = 16
INTERMEDIATE_CHANNEL = 32    # cfg.MODEL.INTERMEDIATE_CHANNEL
HEAD_CONV = 32               # cfg.MODEL.HEAD_CONV
HEADS = {"hm": 4, "wh": 2, "reg": 2}     # KeypointHead branches
N_OUT = sum(HEADS.values())              # 8 fused output channels
HEAD_N_PAD = 128             # fused head 3x3 width 3*32 = 96, padded lane-dense

H_IN = W_IN = 16             # example input spatial size
H_OUT = W_OUT = 8            # after the stride-2 stem
M_OUT = H_OUT * W_OUT        # 64 output pixels per image


# ----------------------------------------------------------------------------
# One-hot tap-gather matrices (trace-time numpy constants)
# ----------------------------------------------------------------------------
def _build_tap_gather(h_in, w_in, h_out, w_out, stride):
    """(9*h_out*w_out, h_in*w_in) one-hot matrix: rows [t*M:(t+1)*M] gather, for
    3x3/pad=1 tap t=(dy,dx), input pixel (stride*y+dy-1, stride*x+dx-1) of output
    pixel (y,x); all-zero row where the tap lands in the zero padding."""
    m, p = h_out * w_out, h_in * w_in
    s = np.zeros((9 * m, p), np.float32)
    for t in range(9):
        dy, dx = t // 3, t % 3
        for y in range(h_out):
            for x in range(w_out):
                iy, ix = stride * y + dy - 1, stride * x + dx - 1
                if 0 <= iy < h_in and 0 <= ix < w_in:
                    s[t * m + y * w_out + x, iy * w_in + ix] = 1.0
    return s


_S1_NP = _build_tap_gather(H_IN, W_IN, H_OUT, W_OUT, stride=2)   # (576, 256)
_S2_NP = _build_tap_gather(H_OUT, W_OUT, H_OUT, W_OUT, stride=1)  # (576, 64)


# ----------------------------------------------------------------------------
# The fused Pallas kernel: one grid step = full forward for one batch element
# ----------------------------------------------------------------------------
def _fused_forward_kernel(x_ref, s1_ref, w1_ref, b1_ref,
                          s2_ref, w2_ref, b2_ref,
                          wh3_ref, bh3_ref, wh1_ref, bh1_ref,
                          o_ref):
    f32, bf16 = jnp.float32, jnp.bfloat16

    def conv3x3(x_in, s_ref, w_ref, bias, *, relu):
        # In-kernel fused im2col: one-hot gather matmul (exact selection of the
        # bf16 activation values) followed by 9 bf16 tap matmuls accumulated
        # into an f32 accumulator on the MXU.  Nothing is materialized in HBM.
        taps = jnp.dot(s_ref[...], x_in, preferred_element_type=f32)   # (9*M, Cin)
        taps = taps.astype(bf16)                                       # exact
        cout = w_ref.shape[-1]
        acc = jnp.zeros((M_OUT, cout), f32)
        for t in range(9):                      # static unroll over the 9 taps
            acc = acc + jnp.dot(taps[t * M_OUT:(t + 1) * M_OUT, :], w_ref[t],
                                preferred_element_type=f32)
        acc = acc + bias                        # bias hoisted out of the tap loop
        return jnp.maximum(acc, 0.0) if relu else acc

    x = x_ref[0]                                                        # (256, 8) bf16
    # backbone stem: stride-2 conv + ReLU, then stride-1 conv + ReLU
    x1 = conv3x3(x, s1_ref, w1_ref, b1_ref[...], relu=True)             # (64, 16) f32
    x2 = conv3x3(x1.astype(bf16), s2_ref, w2_ref, b2_ref[...], relu=True)   # (64, 32)
    # KeypointHead: all three branch 3x3 convs fused (Cout 96 padded to 128) ...
    h = conv3x3(x2.astype(bf16), s2_ref, wh3_ref, bh3_ref[...], relu=True)  # (64, 128)
    # ... then one block-diagonal 1x1 producing the hm|wh|reg channels
    out = jnp.dot(h.astype(bf16), wh1_ref[...], preferred_element_type=f32)
    o_ref[0] = out + bh1_ref[...]                                       # (64, 8) f32


# ----------------------------------------------------------------------------
# Weight packing (PyTorch OIHW layout -> kernel layouts), done once per call
# ----------------------------------------------------------------------------
def _pack_conv3x3(w_oihw, cin_pad=None, cout_pad=None):
    """(Cout, Cin, 3, 3) -> (9, Cin[_pad], Cout[_pad]) bf16, tap-major (dy, dx)."""
    cout, cin = w_oihw.shape[0], w_oihw.shape[1]
    w = jnp.transpose(w_oihw, (2, 3, 1, 0)).reshape(9, cin, cout)
    if cin_pad and cin_pad > cin:
        w = jnp.pad(w, ((0, 0), (0, cin_pad - cin), (0, 0)))
    if cout_pad and cout_pad > cout:
        w = jnp.pad(w, ((0, 0), (0, 0), (0, cout_pad - cout)))
    return w.astype(jnp.bfloat16)


def _pack_head(params):
    """Fuse hm/wh/reg: one 3x3 weight (32 -> 96, padded to 128) and one
    block-diagonal 1x1 weight (128 -> 8), plus the matching fused biases."""
    w3 = jnp.concatenate([params[f"{n}_conv"][0] for n in HEADS], axis=0)   # (96,32,3,3)
    b3 = jnp.concatenate([params[f"{n}_conv"][1] for n in HEADS], axis=0)   # (96,)
    w3p = _pack_conv3x3(w3, cout_pad=HEAD_N_PAD)                            # (9,32,128)
    b3p = jnp.pad(b3, (0, HEAD_N_PAD - b3.shape[0])).reshape(1, HEAD_N_PAD)

    w1 = jnp.zeros((HEAD_N_PAD, N_OUT), jnp.float32)
    b1 = []
    row = col = 0
    for n, c in HEADS.items():
        wo, bo = params[f"{n}_out"]                       # (c, 32, 1, 1), (c,)
        w1 = w1.at[row:row + HEAD_CONV, col:col + c].set(
            jnp.transpose(wo.reshape(c, HEAD_CONV)))
        b1.append(bo)
        row += HEAD_CONV
        col += c
    return (w3p, b3p.astype(jnp.float32),
            w1.astype(jnp.bfloat16), jnp.concatenate(b1).reshape(1, N_OUT))


# ----------------------------------------------------------------------------
# Forward pass: x -> backbone -> head   (matches BackBoneWithHead.forward)
# ----------------------------------------------------------------------------
@jax.jit
def backbone_with_head_forward(params, x_nchw):
    B = x_nchw.shape[0]

    # single cheap layout pass: NCHW -> NHWC, pad Cin 3->8, flatten pixels, bf16
    x = jnp.transpose(x_nchw, (0, 2, 3, 1)).astype(jnp.float32)
    x = jnp.pad(x, ((0, 0), (0, 0), (0, 0), (0, CIN_PAD - IN_CH)))
    x = x.reshape(B, H_IN * W_IN, CIN_PAD).astype(jnp.bfloat16)

    s1 = jnp.asarray(_S1_NP, jnp.bfloat16)                  # (576, 256) one-hot taps
    s2 = jnp.asarray(_S2_NP, jnp.bfloat16)                  # (576, 64)

    w1 = _pack_conv3x3(params["stem1"][0], cin_pad=CIN_PAD)  # (9, 8, 16)
    b1 = params["stem1"][1].reshape(1, STEM1_CH).astype(jnp.float32)
    w2 = _pack_conv3x3(params["stem2"][0])                   # (9, 16, 32)
    b2 = params["stem2"][1].reshape(1, INTERMEDIATE_CHANNEL).astype(jnp.float32)
    wh3, bh3, wh1, bh1 = _pack_head(params)

    out = pl.pallas_call(
        _fused_forward_kernel,
        out_shape=jax.ShapeDtypeStruct((B, M_OUT, N_OUT), jnp.float32),
        grid_spec=pltpu.PrefetchScalarGridSpec(
            num_scalar_prefetch=0,
            grid=(B,),                               # >= 2 parallel steps so both
            in_specs=[                               # v7x TensorCores stay busy
                pl.BlockSpec((1, H_IN * W_IN, CIN_PAD), lambda b: (b, 0, 0)),
                pl.BlockSpec(s1.shape, lambda b: (0, 0)),
                pl.BlockSpec(w1.shape, lambda b: (0, 0, 0)),
                pl.BlockSpec(b1.shape, lambda b: (0, 0)),
                pl.BlockSpec(s2.shape, lambda b: (0, 0)),
                pl.BlockSpec(w2.shape, lambda b: (0, 0, 0)),
                pl.BlockSpec(b2.shape, lambda b: (0, 0)),
                pl.BlockSpec(wh3.shape, lambda b: (0, 0, 0)),
                pl.BlockSpec(bh3.shape, lambda b: (0, 0)),
                pl.BlockSpec(wh1.shape, lambda b: (0, 0)),
                pl.BlockSpec(bh1.shape, lambda b: (0, 0)),
            ],
            out_specs=pl.BlockSpec((1, M_OUT, N_OUT), lambda b: (b, 0, 0)),
        ),
        compiler_params=pltpu.CompilerParams(dimension_semantics=("parallel",)),
    )(x, s1, w1, b1, s2, w2, b2, wh3, bh3, wh1, bh1)

    # split fused channels back into the three head maps, return NCHW
    out = out.reshape(B, H_OUT, W_OUT, N_OUT)
    maps, c = {}, 0
    for name, nc in HEADS.items():
        maps[name] = jnp.transpose(out[..., c:c + nc], (0, 3, 1, 2))
        c += nc
    return maps


# ----------------------------------------------------------------------------
# Deterministic synthetic parameters (no checkpoint loading)
# ----------------------------------------------------------------------------
def _init_conv(key, cout, cin, k):
    kw, kb = jax.random.split(key)
    fan_in = cin * k * k
    w = jax.random.normal(kw, (cout, cin, k, k), jnp.float32) * (2.0 / fan_in) ** 0.5
    b = jax.random.normal(kb, (cout,), jnp.float32) * 0.01
    return w, b


def init_params(key):
    keys = jax.random.split(key, 2 + 2 * len(HEADS))
    params = {
        # backbone conv stem stand-in (the real factory backbones are external)
        "stem1": _init_conv(keys[0], STEM1_CH, IN_CH, 3),
        "stem2": _init_conv(keys[1], INTERMEDIATE_CHANNEL, STEM1_CH, 3),
    }
    # KeypointHead: per branch Conv3x3(inter->head_conv)+ReLU, Conv1x1(head_conv->out)
    for i, (name, nout) in enumerate(HEADS.items()):
        params[f"{name}_conv"] = _init_conv(keys[2 + 2 * i], HEAD_CONV,
                                            INTERMEDIATE_CHANNEL, 3)
        params[f"{name}_out"] = _init_conv(keys[3 + 2 * i], nout, HEAD_CONV, 1)
    return params


# ----------------------------------------------------------------------------
# Plain-XLA reference mirroring the kernel numerics (bf16 operands, f32 accum)
# ----------------------------------------------------------------------------
def _reference_forward(params, x_nchw):
    def conv(x, w, b, *, stride, relu, k):
        xb = x.astype(jnp.bfloat16).astype(jnp.float32)
        wb = w.astype(jnp.bfloat16).astype(jnp.float32)
        pad = ((1, 1), (1, 1)) if k == 3 else ((0, 0), (0, 0))
        y = jax.lax.conv_general_dilated(
            xb, jnp.transpose(wb, (2, 3, 1, 0)), (stride, stride), pad,
            dimension_numbers=("NHWC", "HWIO", "NHWC"))
        y = y + b
        return jnp.maximum(y, 0.0) if relu else y

    x = jnp.transpose(x_nchw, (0, 2, 3, 1)).astype(jnp.float32)
    x = conv(x, *params["stem1"], stride=2, relu=True, k=3)
    x = conv(x, *params["stem2"], stride=1, relu=True, k=3)
    outs = {}
    for name in HEADS:
        h = conv(x, *params[f"{name}_conv"], stride=1, relu=True, k=3)
        o = conv(h, *params[f"{name}_out"], stride=1, relu=False, k=1)
        outs[name] = jnp.transpose(o, (0, 3, 1, 2))
    return outs


if __name__ == "__main__":
    key = jax.random.PRNGKey(0)
    k_param, k_x = jax.random.split(key)
    params = init_params(k_param)
    x = jax.random.normal(k_x, (2, IN_CH, H_IN, W_IN), jnp.float32)   # NCHW input

    outs = backbone_with_head_forward(params, x)
    jax.block_until_ready(outs)

    # shape check (stride-2 backbone => 8x8 maps)
    assert outs["hm"].shape == (2, 4, 8, 8)
    assert outs["wh"].shape == (2, 2, 8, 8)
    assert outs["reg"].shape == (2, 2, 8, 8)

    # numeric check against a plain-XLA reference with matching bf16/f32 numerics
    ref = _reference_forward(params, x)
    for name in HEADS:
        err = float(jnp.max(jnp.abs(outs[name] - ref[name])))
        assert err < 5e-2, f"{name}: max abs err {err}"

    print("KERNEL_OK")
</pallas_src>

<mosaic_0001>
module attributes {stable_mosaic.version = 11 : i64} {
  func.func @_fused_forward_kernel(%arg0: i32, %arg1: memref<1x256x8xbf16, #tpu.memory_space<vmem>>, %arg2: memref<576x256xbf16, #tpu.memory_space<vmem>>, %arg3: memref<9x8x16xbf16, #tpu.memory_space<vmem>>, %arg4: memref<1x16xf32, #tpu.memory_space<vmem>>, %arg5: memref<576x64xbf16, #tpu.memory_space<vmem>>, %arg6: memref<9x16x32xbf16, #tpu.memory_space<vmem>>, %arg7: memref<1x32xf32, #tpu.memory_space<vmem>>, %arg8: memref<9x32x128xbf16, #tpu.memory_space<vmem>>, %arg9: memref<1x128xf32, #tpu.memory_space<vmem>>, %arg10: memref<128x8xbf16, #tpu.memory_space<vmem>>, %arg11: memref<1x8xf32, #tpu.memory_space<vmem>>, %arg12: memref<1x64x8xf32, #tpu.memory_space<vmem>>) attributes {dimension_semantics = [#tpu.dimension_semantics<parallel>], iteration_bounds = array<i64: 2>, scalar_prefetch = 0 : i64, scratch_operands = 0 : i64, tpu.core_type = #tpu.core_type<tc>, window_params = [{transform_indices = @transform_0, window_bounds = array<i64: 1, 256, 8>}, {pipeline_mode = #tpu.pipeline_mode<synchronous>, transform_indices = @transform_1, window_bounds = array<i64: 576, 256>}, {pipeline_mode = #tpu.pipeline_mode<synchronous>, transform_indices = @transform_2, window_bounds = array<i64: 9, 8, 16>}, {pipeline_mode = #tpu.pipeline_mode<synchronous>, transform_indices = @transform_3, window_bounds = array<i64: 1, 16>}, {pipeline_mode = #tpu.pipeline_mode<synchronous>, transform_indices = @transform_4, window_bounds = array<i64: 576, 64>}, {pipeline_mode = #tpu.pipeline_mode<synchronous>, transform_indices = @transform_5, window_bounds = array<i64: 9, 16, 32>}, {pipeline_mode = #tpu.pipeline_mode<synchronous>, transform_indices = @transform_6, window_bounds = array<i64: 1, 32>}, {pipeline_mode = #tpu.pipeline_mode<synchronous>, transform_indices = @transform_7, window_bounds = array<i64: 9, 32, 128>}, {pipeline_mode = #tpu.pipeline_mode<synchronous>, transform_indices = @transform_8, window_bounds = array<i64: 1, 128>}, {pipeline_mode = #tpu.pipeline_mode<synchronous>, transform_indices = @transform_9, window_bounds = array<i64: 128, 8>}, {pipeline_mode = #tpu.pipeline_mode<synchronous>, transform_indices = @transform_10, window_bounds = array<i64: 1, 8>}, {transform_indices = @transform_11, window_bounds = array<i64: 1, 64, 8>}]} {
    %c0 = arith.constant 0 : index
    %c0_0 = arith.constant 0 : index
    %c0_1 = arith.constant 0 : index
    %0 = vector.load %arg1[%c0, %c0_0, %c0_1] : memref<1x256x8xbf16, #tpu.memory_space<vmem>>, vector<1x256x8xbf16>
    %1 = vector.shape_cast %0 : vector<1x256x8xbf16> to vector<256x8xbf16>
    %c0_2 = arith.constant 0 : index
    %c0_3 = arith.constant 0 : index
    %2 = vector.load %arg4[%c0_2, %c0_3] : memref<1x16xf32, #tpu.memory_space<vmem>>, vector<1x16xf32>
    %c0_4 = arith.constant 0 : index
    %c0_5 = arith.constant 0 : index
    %3 = vector.load %arg2[%c0_4, %c0_5] : memref<576x256xbf16, #tpu.memory_space<vmem>>, vector<576x256xbf16>
    %cst = arith.constant dense<0.000000e+00> : vector<576x8xf32>
    %4 = tpu.matmul %3, %1, %cst {dimension_numbers = #tpu.dot_dimension_numbers<[1], [0], [0], [1], [0, 0, 1, 1], [], []>} : vector<576x256xbf16>, vector<256x8xbf16>, vector<576x8xf32> -> vector<576x8xf32>
    %5 = arith.truncf %4 : vector<576x8xf32> to vector<576x8xbf16>
    %cst_6 = arith.constant 0.000000e+00 : f32
    %6 = vector.broadcast %cst_6 : f32 to vector<64x16xf32>
    %7 = vector.extract_strided_slice %5 {offsets = [0, 0], sizes = [64, 8], strides = [1, 1]} : vector<576x8xbf16> to vector<64x8xbf16>
    %c0_7 = arith.constant 0 : index
    %c0_8 = arith.constant 0 : index
    %c0_9 = arith.constant 0 : index
    %8 = vector.load %arg3[%c0_7, %c0_8, %c0_9] : memref<9x8x16xbf16, #tpu.memory_space<vmem>>, vector<1x8x16xbf16>
    %9 = vector.shape_cast %8 : vector<1x8x16xbf16> to vector<8x16xbf16>
    %cst_10 = arith.constant dense<0.000000e+00> : vector<64x16xf32>
    %10 = tpu.matmul %7, %9, %cst_10 {dimension_numbers = #tpu.dot_dimension_numbers<[1], [0], [0], [1], [0, 0, 1, 1], [], []>} : vector<64x8xbf16>, vector<8x16xbf16>, vector<64x16xf32> -> vector<64x16xf32>
    %11 = arith.addf %6, %10 : vector<64x16xf32>
    %12 = vector.extract_strided_slice %5 {offsets = [64, 0], sizes = [64, 8], strides = [1, 1]} : vector<576x8xbf16> to vector<64x8xbf16>
    %c1 = arith.constant 1 : index
    %c0_11 = arith.constant 0 : index
    %c0_12 = arith.constant 0 : index
    %13 = vector.load %arg3[%c1, %c0_11, %c0_12] : memref<9x8x16xbf16, #tpu.memory_space<vmem>>, vector<1x8x16xbf16>
    %14 = vector.shape_cast %13 : vector<1x8x16xbf16> to vector<8x16xbf16>
    %cst_13 = arith.constant dense<0.000000e+00> : vector<64x16xf32>
    %15 = tpu.matmul %12, %14, %cst_13 {dimension_numbers = #tpu.dot_dimension_numbers<[1], [0], [0], [1], [0, 0, 1, 1], [], []>} : vector<64x8xbf16>, vector<8x16xbf16>, vector<64x16xf32> -> vector<64x16xf32>
    %16 = arith.addf %11, %15 : vector<64x16xf32>
    %17 = vector.extract_strided_slice %5 {offsets = [128, 0], sizes = [64, 8], strides = [1, 1]} : vector<576x8xbf16> to vector<64x8xbf16>
    %c2 = arith.constant 2 : index
    %c0_14 = arith.constant 0 : index
    %c0_15 = arith.constant 0 : index
    %18 = vector.load %arg3[%c2, %c0_14, %c0_15] : memref<9x8x16xbf16, #tpu.memory_space<vmem>>, vector<1x8x16xbf16>
    %19 = vector.shape_cast %18 : vector<1x8x16xbf16> to vector<8x16xbf16>
    %cst_16 = arith.constant dense<0.000000e+00> : vector<64x16xf32>
    %20 = tpu.matmul %17, %19, %cst_16 {dimension_numbers = #tpu.dot_dimension_numbers<[1], [0], [0], [1], [0, 0, 1, 1], [], []>} : vector<64x8xbf16>, vector<8x16xbf16>, vector<64x16xf32> -> vector<64x16xf32>
    %21 = arith.addf %16, %20 : vector<64x16xf32>
    %22 = vector.extract_strided_slice %5 {offsets = [192, 0], sizes = [64, 8], strides = [1, 1]} : vector<576x8xbf16> to vector<64x8xbf16>
    %c3 = arith.constant 3 : index
    %c0_17 = arith.constant 0 : index
    %c0_18 = arith.constant 0 : index
    %23 = vector.load %arg3[%c3, %c0_17, %c0_18] : memref<9x8x16xbf16, #tpu.memory_space<vmem>>, vector<1x8x16xbf16>
    %24 = vector.shape_cast %23 : vector<1x8x16xbf16> to vector<8x16xbf16>
    %cst_19 = arith.constant dense<0.000000e+00> : vector<64x16xf32>
    %25 = tpu.matmul %22, %24, %cst_19 {dimension_numbers = #tpu.dot_dimension_numbers<[1], [0], [0], [1], [0, 0, 1, 1], [], []>} : vector<64x8xbf16>, vector<8x16xbf16>, vector<64x16xf32> -> vector<64x16xf32>
    %26 = arith.addf %21, %25 : vector<64x16xf32>
    %27 = vector.extract_strided_slice %5 {offsets = [256, 0], sizes = [64, 8], strides = [1, 1]} : vector<576x8xbf16> to vector<64x8xbf16>
    %c4 = arith.constant 4 : index
    %c0_20 = arith.constant 0 : index
    %c0_21 = arith.constant 0 : index
    %28 = vector.load %arg3[%c4, %c0_20, %c0_21] : memref<9x8x16xbf16, #tpu.memory_space<vmem>>, vector<1x8x16xbf16>
    %29 = vector.shape_cast %28 : vector<1x8x16xbf16> to vector<8x16xbf16>
    %cst_22 = arith.constant dense<0.000000e+00> : vector<64x16xf32>
    %30 = tpu.matmul %27, %29, %cst_22 {dimension_numbers = #tpu.dot_dimension_numbers<[1], [0], [0], [1], [0, 0, 1, 1], [], []>} : vector<64x8xbf16>, vector<8x16xbf16>, vector<64x16xf32> -> vector<64x16xf32>
    %31 = arith.addf %26, %30 : vector<64x16xf32>
    %32 = vector.extract_strided_slice %5 {offsets = [320, 0], sizes = [64, 8], strides = [1, 1]} : vector<576x8xbf16> to vector<64x8xbf16>
    %c5 = arith.constant 5 : index
    %c0_23 = arith.constant 0 : index
    %c0_24 = arith.constant 0 : index
    %33 = vector.load %arg3[%c5, %c0_23, %c0_24] : memref<9x8x16xbf16, #tpu.memory_space<vmem>>, vector<1x8x16xbf16>
    %34 = vector.shape_cast %33 : vector<1x8x16xbf16> to vector<8x16xbf16>
    %cst_25 = arith.constant dense<0.000000e+00> : vector<64x16xf32>
    %35 = tpu.matmul %32, %34, %cst_25 {dimension_numbers = #tpu.dot_dimension_numbers<[1], [0], [0], [1], [0, 0, 1, 1], [], []>} : vector<64x8xbf16>, vector<8x16xbf16>, vector<64x16xf32> -> vector<64x16xf32>
    %36 = arith.addf %31, %35 : vector<64x16xf32>
    %37 = vector.extract_strided_slice %5 {offsets = [384, 0], sizes = [64, 8], strides = [1, 1]} : vector<576x8xbf16> to vector<64x8xbf16>
    %c6 = arith.constant 6 : index
    %c0_26 = arith.constant 0 : index
    %c0_27 = arith.constant 0 : index
    %38 = vector.load %arg3[%c6, %c0_26, %c0_27] : memref<9x8x16xbf16, #tpu.memory_space<vmem>>, vector<1x8x16xbf16>
    %39 = vector.shape_cast %38 : vector<1x8x16xbf16> to vector<8x16xbf16>
    %cst_28 = arith.constant dense<0.000000e+00> : vector<64x16xf32>
    %40 = tpu.matmul %37, %39, %cst_28 {dimension_numbers = #tpu.dot_dimension_numbers<[1], [0], [0], [1], [0, 0, 1, 1], [], []>} : vector<64x8xbf16>, vector<8x16xbf16>, vector<64x16xf32> -> vector<64x16xf32>
    %41 = arith.addf %36, %40 : vector<64x16xf32>
    %42 = vector.extract_strided_slice %5 {offsets = [448, 0], sizes = [64, 8], strides = [1, 1]} : vector<576x8xbf16> to vector<64x8xbf16>
    %c7 = arith.constant 7 : index
    %c0_29 = arith.constant 0 : index
    %c0_30 = arith.constant 0 : index
    %43 = vector.load %arg3[%c7, %c0_29, %c0_30] : memref<9x8x16xbf16, #tpu.memory_space<vmem>>, vector<1x8x16xbf16>
    %44 = vector.shape_cast %43 : vector<1x8x16xbf16> to vector<8x16xbf16>
    %cst_31 = arith.constant dense<0.000000e+00> : vector<64x16xf32>
    %45 = tpu.matmul %42, %44, %cst_31 {dimension_numbers = #tpu.dot_dimension_numbers<[1], [0], [0], [1], [0, 0, 1, 1], [], []>} : vector<64x8xbf16>, vector<8x16xbf16>, vector<64x16xf32> -> vector<64x16xf32>
    %46 = arith.addf %41, %45 : vector<64x16xf32>
    %47 = vector.extract_strided_slice %5 {offsets = [512, 0], sizes = [64, 8], strides = [1, 1]} : vector<576x8xbf16> to vector<64x8xbf16>
    %c8 = arith.constant 8 : index
    %c0_32 = arith.constant 0 : index
    %c0_33 = arith.constant 0 : index
    %48 = vector.load %arg3[%c8, %c0_32, %c0_33] : memref<9x8x16xbf16, #tpu.memory_space<vmem>>, vector<1x8x16xbf16>
    %49 = vector.shape_cast %48 : vector<1x8x16xbf16> to vector<8x16xbf16>
    %cst_34 = arith.constant dense<0.000000e+00> : vector<64x16xf32>
    %50 = tpu.matmul %47, %49, %cst_34 {dimension_numbers = #tpu.dot_dimension_numbers<[1], [0], [0], [1], [0, 0, 1, 1], [], []>} : vector<64x8xbf16>, vector<8x16xbf16>, vector<64x16xf32> -> vector<64x16xf32>
    %51 = arith.addf %46, %50 : vector<64x16xf32>
    %52 = vector.broadcast %2 : vector<1x16xf32> to vector<64x16xf32>
    %53 = arith.addf %51, %52 : vector<64x16xf32>
    %cst_35 = arith.constant 0.000000e+00 : f32
    %54 = vector.broadcast %cst_35 : f32 to vector<64x16xf32>
    %55 = arith.maximumf %53, %54 : vector<64x16xf32>
    %56 = arith.truncf %55 : vector<64x16xf32> to vector<64x16xbf16>
    %c0_36 = arith.constant 0 : index
    %c0_37 = arith.constant 0 : index
    %57 = vector.load %arg7[%c0_36, %c0_37] : memref<1x32xf32, #tpu.memory_space<vmem>>, vector<1x32xf32>
    %c0_38 = arith.constant 0 : index
    %c0_39 = arith.constant 0 : index
    %58 = vector.load %arg5[%c0_38, %c0_39] : memref<576x64xbf16, #tpu.memory_space<vmem>>, vector<576x64xbf16>
    %cst_40 = arith.constant dense<0.000000e+00> : vector<576x16xf32>
    %59 = tpu.matmul %58, %56, %cst_40 {dimension_numbers = #tpu.dot_dimension_numbers<[1], [0], [0], [1], [0, 0, 1, 1], [], []>} : vector<576x64xbf16>, vector<64x16xbf16>, vector<576x16xf32> -> vector<576x16xf32>
    %60 = arith.truncf %59 : vector<576x16xf32> to vector<576x16xbf16>
    %cst_41 = arith.constant 0.000000e+00 : f32
    %61 = vector.broadcast %cst_41 : f32 to vector<64x32xf32>
    %62 = vector.extract_strided_slice %60 {offsets = [0, 0], sizes = [64, 16], strides = [1, 1]} : vector<576x16xbf16> to vector<64x16xbf16>
    %c0_42 = arith.constant 0 : index
    %c0_43 = arith.constant 0 : index
    %c0_44 = arith.constant 0 : index
    %63 = vector.load %arg6[%c0_42, %c0_43, %c0_44] : memref<9x16x32xbf16, #tpu.memory_space<vmem>>, vector<1x16x32xbf16>
    %64 = vector.shape_cast %63 : vector<1x16x32xbf16> to vector<16x32xbf16>
    %cst_45 = arith.constant dense<0.000000e+00> : vector<64x32xf32>
    %65 = tpu.matmul %62, %64, %cst_45 {dimension_numbers = #tpu.dot_dimension_numbers<[1], [0], [0], [1], [0, 0, 1, 1], [], []>} : vector<64x16xbf16>, vector<16x32xbf16>, vector<64x32xf32> -> vector<64x32xf32>
    %66 = arith.addf %61, %65 : vector<64x32xf32>
    %67 = vector.extract_strided_slice %60 {offsets = [64, 0], sizes = [64, 16], strides = [1, 1]} : vector<576x16xbf16> to vector<64x16xbf16>
    %c1_46 = arith.constant 1 : index
    %c0_47 = arith.constant 0 : index
    %c0_48 = arith.constant 0 : index
    %68 = vector.load %arg6[%c1_46, %c0_47, %c0_48] : memref<9x16x32xbf16, #tpu.memory_space<vmem>>, vector<1x16x32xbf16>
    %69 = vector.shape_cast %68 : vector<1x16x32xbf16> to vector<16x32xbf16>
    %cst_49 = arith.constant dense<0.000000e+00> : vector<64x32xf32>
    %70 = tpu.matmul %67, %69, %cst_49 {dimension_numbers = #tpu.dot_dimension_numbers<[1], [0], [0], [1], [0, 0, 1, 1], [], []>} : vector<64x16xbf16>, vector<16x32xbf16>, vector<64x32xf32> -> vector<64x32xf32>
    %71 = arith.addf %66, %70 : vector<64x32xf32>
    %72 = vector.extract_strided_slice %60 {offsets = [128, 0], sizes = [64, 16], strides = [1, 1]} : vector<576x16xbf16> to vector<64x16xbf16>
    %c2_50 = arith.constant 2 : index
    %c0_51 = arith.constant 0 : index
    %c0_52 = arith.constant 0 : index
    %73 = vector.load %arg6[%c2_50, %c0_51, %c0_52] : memref<9x16x32xbf16, #tpu.memory_space<vmem>>, vector<1x16x32xbf16>
    %74 = vector.shape_cast %73 : vector<1x16x32xbf16> to vector<16x32xbf16>
    %cst_53 = arith.constant dense<0.000000e+00> : vector<64x32xf32>
    %75 = tpu.matmul %72, %74, %cst_53 {dimension_numbers = #tpu.dot_dimension_numbers<[1], [0], [0], [1], [0, 0, 1, 1], [], []>} : vector<64x16xbf16>, vector<16x32xbf16>, vector<64x32xf32> -> vector<64x32xf32>
    %76 = arith.addf %71, %75 : vector<64x32xf32>
    %77 = vector.extract_strided_slice %60 {offsets = [192, 0], sizes = [64, 16], strides = [1, 1]} : vector<576x16xbf16> to vector<64x16xbf16>
    %c3_54 = arith.constant 3 : index
    %c0_55 = arith.constant 0 : index
    %c0_56 = arith.constant 0 : index
    %78 = vector.load %arg6[%c3_54, %c0_55, %c0_56] : memref<9x16x32xbf16, #tpu.memory_space<vmem>>, vector<1x16x32xbf16>
    %79 = vector.shape_cast %78 : vector<1x16x32xbf16> to vector<16x32xbf16>
    %cst_57 = arith.constant dense<0.000000e+00> : vector<64x32xf32>
    %80 = tpu.matmul %77, %79, %cst_57 {dimension_numbers = #tpu.dot_dimension_numbers<[1], [0], [0], [1], [0, 0, 1, 1], [], []>} : vector<64x16xbf16>, vector<16x32xbf16>, vector<64x32xf32> -> vector<64x32xf32>
    %81 = arith.addf %76, %80 : vector<64x32xf32>
    %82 = vector.extract_strided_slice %60 {offsets = [256, 0], sizes = [64, 16], strides = [1, 1]} : vector<576x16xbf16> to vector<64x16xbf16>
    %c4_58 = arith.constant 4 : index
    %c0_59 = arith.constant 0 : index
    %c0_60 = arith.constant 0 : index
    %83 = vector.load %arg6[%c4_58, %c0_59, %c0_60] : memref<9x16x32xbf16, #tpu.memory_space<vmem>>, vector<1x16x32xbf16>
    %84 = vector.shape_cast %83 : vector<1x16x32xbf16> to vector<16x32xbf16>
    %cst_61 = arith.constant dense<0.000000e+00> : vector<64x32xf32>
    %85 = tpu.matmul %82, %84, %cst_61 {dimension_numbers = #tpu.dot_dimension_numbers<[1], [0], [0], [1], [0, 0, 1, 1], [], []>} : vector<64x16xbf16>, vector<16x32xbf16>, vector<64x32xf32> -> vector<64x32xf32>
    %86 = arith.addf %81, %85 : vector<64x32xf32>
    %87 = vector.extract_strided_slice %60 {offsets = [320, 0], sizes = [64, 16], strides = [1, 1]} : vector<576x16xbf16> to vector<64x16xbf16>
    %c5_62 = arith.constant 5 : index
    %c0_63 = arith.constant 0 : index
    %c0_64 = arith.constant 0 : index
    %88 = vector.load %arg6[%c5_62, %c0_63, %c0_64] : memref<9x16x32xbf16, #tpu.memory_space<vmem>>, vector<1x16x32xbf16>
    %89 = vector.shape_cast %88 : vector<1x16x32xbf16> to vector<16x32xbf16>
    %cst_65 = arith.constant dense<0.000000e+00> : vector<64x32xf32>
    %90 = tpu.matmul %87, %89, %cst_65 {dimension_numbers = #tpu.dot_dimension_numbers<[1], [0], [0], [1], [0, 0, 1, 1], [], []>} : vector<64x16xbf16>, vector<16x32xbf16>, vector<64x32xf32> -> vector<64x32xf32>
    %91 = arith.addf %86, %90 : vector<64x32xf32>
    %92 = vector.extract_strided_slice %60 {offsets = [384, 0], sizes = [64, 16], strides = [1, 1]} : vector<576x16xbf16> to vector<64x16xbf16>
    %c6_66 = arith.constant 6 : index
    %c0_67 = arith.constant 0 : index
    %c0_68 = arith.constant 0 : index
    %93 = vector.load %arg6[%c6_66, %c0_67, %c0_68] : memref<9x16x32xbf16, #tpu.memory_space<vmem>>, vector<1x16x32xbf16>
    %94 = vector.shape_cast %93 : vector<1x16x32xbf16> to vector<16x32xbf16>
    %cst_69 = arith.constant dense<0.000000e+00> : vector<64x32xf32>
    %95 = tpu.matmul %92, %94, %cst_69 {dimension_numbers = #tpu.dot_dimension_numbers<[1], [0], [0], [1], [0, 0, 1, 1], [], []>} : vector<64x16xbf16>, vector<16x32xbf16>, vector<64x32xf32> -> vector<64x32xf32>
    %96 = arith.addf %91, %95 : vector<64x32xf32>
    %97 = vector.extract_strided_slice %60 {offsets = [448, 0], sizes = [64, 16], strides = [1, 1]} : vector<576x16xbf16> to vector<64x16xbf16>
    %c7_70 = arith.constant 7 : index
    %c0_71 = arith.constant 0 : index
    %c0_72 = arith.constant 0 : index
    %98 = vector.load %arg6[%c7_70, %c0_71, %c0_72] : memref<9x16x32xbf16, #tpu.memory_space<vmem>>, vector<1x16x32xbf16>
    %99 = vector.shape_cast %98 : vector<1x16x32xbf16> to vector<16x32xbf16>
    %cst_73 = arith.constant dense<0.000000e+00> : vector<64x32xf32>
    %100 = tpu.matmul %97, %99, %cst_73 {dimension_numbers = #tpu.dot_dimension_numbers<[1], [0], [0], [1], [0, 0, 1, 1], [], []>} : vector<64x16xbf16>, vector<16x32xbf16>, vector<64x32xf32> -> vector<64x32xf32>
    %101 = arith.addf %96, %100 : vector<64x32xf32>
    %102 = vector.extract_strided_slice %60 {offsets = [512, 0], sizes = [64, 16], strides = [1, 1]} : vector<576x16xbf16> to vector<64x16xbf16>
    %c8_74 = arith.constant 8 : index
    %c0_75 = arith.constant 0 : index
    %c0_76 = arith.constant 0 : index
    %103 = vector.load %arg6[%c8_74, %c0_75, %c0_76] : memref<9x16x32xbf16, #tpu.memory_space<vmem>>, vector<1x16x32xbf16>
    %104 = vector.shape_cast %103 : vector<1x16x32xbf16> to vector<16x32xbf16>
    %cst_77 = arith.constant dense<0.000000e+00> : vector<64x32xf32>
    %105 = tpu.matmul %102, %104, %cst_77 {dimension_numbers = #tpu.dot_dimension_numbers<[1], [0], [0], [1], [0, 0, 1, 1], [], []>} : vector<64x16xbf16>, vector<16x32xbf16>, vector<64x32xf32> -> vector<64x32xf32>
    %106 = arith.addf %101, %105 : vector<64x32xf32>
    %107 = vector.broadcast %57 : vector<1x32xf32> to vector<64x32xf32>
    %108 = arith.addf %106, %107 : vector<64x32xf32>
    %cst_78 = arith.constant 0.000000e+00 : f32
    %109 = vector.broadcast %cst_78 : f32 to vector<64x32xf32>
    %110 = arith.maximumf %108, %109 : vector<64x32xf32>
    %111 = arith.truncf %110 : vector<64x32xf32> to vector<64x32xbf16>
    %c0_79 = arith.constant 0 : index
    %c0_80 = arith.constant 0 : index
    %112 = vector.load %arg9[%c0_79, %c0_80] : memref<1x128xf32, #tpu.memory_space<vmem>>, vector<1x128xf32>
    %c0_81 = arith.constant 0 : index
    %c0_82 = arith.constant 0 : index
    %113 = vector.load %arg5[%c0_81, %c0_82] : memref<576x64xbf16, #tpu.memory_space<vmem>>, vector<576x64xbf16>
    %cst_83 = arith.constant dense<0.000000e+00> : vector<576x32xf32>
    %114 = tpu.matmul %113, %111, %cst_83 {dimension_numbers = #tpu.dot_dimension_numbers<[1], [0], [0], [1], [0, 0, 1, 1], [], []>} : vector<576x64xbf16>, vector<64x32xbf16>, vector<576x32xf32> -> vector<576x32xf32>
    %115 = arith.truncf %114 : vector<576x32xf32> to vector<576x32xbf16>
    %cst_84 = arith.constant 0.000000e+00 : f32
    %116 = vector.broadcast %cst_84 : f32 to vector<64x128xf32>
    %117 = vector.extract_strided_slice %115 {offsets = [0, 0], sizes = [64, 32], strides = [1, 1]} : vector<576x32xbf16> to vector<64x32xbf16>
    %c0_85 = arith.constant 0 : index
    %c0_86 = arith.constant 0 : index
    %c0_87 = arith.constant 0 : index
    %118 = vector.load %arg8[%c0_85, %c0_86, %c0_87] : memref<9x32x128xbf16, #tpu.memory_space<vmem>>, vector<1x32x128xbf16>
    %119 = vector.shape_cast %118 : vector<1x32x128xbf16> to vector<32x128xbf16>
    %cst_88 = arith.constant dense<0.000000e+00> : vector<64x128xf32>
    %120 = tpu.matmul %117, %119, %cst_88 {dimension_numbers = #tpu.dot_dimension_numbers<[1], [0], [0], [1], [0, 0, 1, 1], [], []>} : vector<64x32xbf16>, vector<32x128xbf16>, vector<64x128xf32> -> vector<64x128xf32>
    %121 = arith.addf %116, %120 : vector<64x128xf32>
    %122 = vector.extract_strided_slice %115 {offsets = [64, 0], sizes = [64, 32], strides = [1, 1]} : vector<576x32xbf16> to vector<64x32xbf16>
    %c1_89 = arith.constant 1 : index
    %c0_90 = arith.constant 0 : index
    %c0_91 = arith.constant 0 : index
    %123 = vector.load %arg8[%c1_89, %c0_90, %c0_91] : memref<9x32x128xbf16, #tpu.memory_space<vmem>>, vector<1x32x128xbf16>
    %124 = vector.shape_cast %123 : vector<1x32x128xbf16> to vector<32x128xbf16>
    %cst_92 = arith.constant dense<0.000000e+00> : vector<64x128xf32>
    %125 = tpu.matmul %122, %124, %cst_92 {dimension_numbers = #tpu.dot_dimension_numbers<[1], [0], [0], [1], [0, 0, 1, 1], [], []>} : vector<64x32xbf16>, vector<32x128xbf16>, vector<64x128xf32> -> vector<64x128xf32>
    %126 = arith.addf %121, %125 : vector<64x128xf32>
    %127 = vector.extract_strided_slice %115 {offsets = [128, 0], sizes = [64, 32], strides = [1, 1]} : vector<576x32xbf16> to vector<64x32xbf16>
    %c2_93 = arith.constant 2 : index
    %c0_94 = arith.constant 0 : index
    %c0_95 = arith.constant 0 : index
    %128 = vector.load %arg8[%c2_93, %c0_94, %c0_95] : memref<9x32x128xbf16, #tpu.memory_space<vmem>>, vector<1x32x128xbf16>
    %129 = vector.shape_cast %128 : vector<1x32x128xbf16> to vector<32x128xbf16>
    %cst_96 = arith.constant dense<0.000000e+00> : vector<64x128xf32>
    %130 = tpu.matmul %127, %129, %cst_96 {dimension_numbers = #tpu.dot_dimension_numbers<[1], [0], [0], [1], [0, 0, 1, 1], [], []>} : vector<64x32xbf16>, vector<32x128xbf16>, vector<64x128xf32> -> vector<64x128xf32>
    %131 = arith.addf %126, %130 : vector<64x128xf32>
    %132 = vector.extract_strided_slice %115 {offsets = [192, 0], sizes = [64, 32], strides = [1, 1]} : vector<576x32xbf16> to vector<64x32xbf16>
    %c3_97 = arith.constant 3 : index
    %c0_98 = arith.constant 0 : index
    %c0_99 = arith.constant 0 : index
    %133 = vector.load %arg8[%c3_97, %c0_98, %c0_99] : memref<9x32x128xbf16, #tpu.memory_space<vmem>>, vector<1x32x128xbf16>
    %134 = vector.shape_cast %133 : vector<1x32x128xbf16> to vector<32x128xbf16>
    %cst_100 = arith.constant dense<0.000000e+00> : vector<64x128xf32>
    %135 = tpu.matmul %132, %134, %cst_100 {dimension_numbers = #tpu.dot_dimension_numbers<[1], [0], [0], [1], [0, 0, 1, 1], [], []>} : vector<64x32xbf16>, vector<32x128xbf16>, vector<64x128xf32> -> vector<64x128xf32>
    %136 = arith.addf %131, %135 : vector<64x128xf32>
    %137 = vector.extract_strided_slice %115 {offsets = [256, 0], sizes = [64, 32], strides = [1, 1]} : vector<576x32xbf16> to vector<64x32xbf16>
    %c4_101 = arith.constant 4 : index
    %c0_102 = arith.constant 0 : index
    %c0_103 = arith.constant 0 : index
    %138 = vector.load %arg8[%c4_101, %c0_102, %c0_103] : memref<9x32x128xbf16, #tpu.memory_space<vmem>>, vector<1x32x128xbf16>
    %139 = vector.shape_cast %138 : vector<1x32x128xbf16> to vector<32x128xbf16>
    %cst_104 = arith.constant dense<0.000000e+00> : vector<64x128xf32>
    %140 = tpu.matmul %137, %139, %cst_104 {dimension_numbers = #tpu.dot_dimension_numbers<[1], [0], [0], [1], [0, 0, 1, 1], [], []>} : vector<64x32xbf16>, vector<32x128xbf16>, vector<64x128xf32> -> vector<64x128xf32>
    %141 = arith.addf %136, %140 : vector<64x128xf32>
    %142 = vector.extract_strided_slice %115 {offsets = [320, 0], sizes = [64, 32], strides = [1, 1]} : vector<576x32xbf16> to vector<64x32xbf16>
    %c5_105 = arith.constant 5 : index
    %c0_106 = arith.constant 0 : index
    %c0_107 = arith.constant 0 : index
    %143 = vector.load %arg8[%c5_105, %c0_106, %c0_107] : memref<9x32x128xbf16, #tpu.memory_space<vmem>>, vector<1x32x128xbf16>
    %144 = vector.shape_cast %143 : vector<1x32x128xbf16> to vector<32x128xbf16>
    %cst_108 = arith.constant dense<0.000000e+00> : vector<64x128xf32>
    %145 = tpu.matmul %142, %144, %cst_108 {dimension_numbers = #tpu.dot_dimension_numbers<[1], [0], [0], [1], [0, 0, 1, 1], [], []>} : vector<64x32xbf16>, vector<32x128xbf16>, vector<64x128xf32> -> vector<64x128xf32>
    %146 = arith.addf %141, %145 : vector<64x128xf32>
    %147 = vector.extract_strided_slice %115 {offsets = [384, 0], sizes = [64, 32], strides = [1, 1]} : vector<576x32xbf16> to vector<64x32xbf16>
    %c6_109 = arith.constant 6 : index
    %c0_110 = arith.constant 0 : index
    %c0_111 = arith.constant 0 : index
    %148 = vector.load %arg8[%c6_109, %c0_110, %c0_111] : memref<9x32x128xbf16, #tpu.memory_space<vmem>>, vector<1x32x128xbf16>
    %149 = vector.shape_cast %148 : vector<1x32x128xbf16> to vector<32x128xbf16>
    %cst_112 = arith.constant dense<0.000000e+00> : vector<64x128xf32>
    %150 = tpu.matmul %147, %149, %cst_112 {dimension_numbers = #tpu.dot_dimension_numbers<[1], [0], [0], [1], [0, 0, 1, 1], [], []>} : vector<64x32xbf16>, vector<32x128xbf16>, vector<64x128xf32> -> vector<64x128xf32>
    %151 = arith.addf %146, %150 : vector<64x128xf32>
    %152 = vector.extract_strided_slice %115 {offsets = [448, 0], sizes = [64, 32], strides = [1, 1]} : vector<576x32xbf16> to vector<64x32xbf16>
    %c7_113 = arith.constant 7 : index
    %c0_114 = arith.constant 0 : index
    %c0_115 = arith.constant 0 : index
    %153 = vector.load %arg8[%c7_113, %c0_114, %c0_115] : memref<9x32x128xbf16, #tpu.memory_space<vmem>>, vector<1x32x128xbf16>
    %154 = vector.shape_cast %153 : vector<1x32x128xbf16> to vector<32x128xbf16>
    %cst_116 = arith.constant dense<0.000000e+00> : vector<64x128xf32>
    %155 = tpu.matmul %152, %154, %cst_116 {dimension_numbers = #tpu.dot_dimension_numbers<[1], [0], [0], [1], [0, 0, 1, 1], [], []>} : vector<64x32xbf16>, vector<32x128xbf16>, vector<64x128xf32> -> vector<64x128xf32>
    %156 = arith.addf %151, %155 : vector<64x128xf32>
    %157 = vector.extract_strided_slice %115 {offsets = [512, 0], sizes = [64, 32], strides = [1, 1]} : vector<576x32xbf16> to vector<64x32xbf16>
    %c8_117 = arith.constant 8 : index
    %c0_118 = arith.constant 0 : index
    %c0_119 = arith.constant 0 : index
    %158 = vector.load %arg8[%c8_117, %c0_118, %c0_119] : memref<9x32x128xbf16, #tpu.memory_space<vmem>>, vector<1x32x128xbf16>
    %159 = vector.shape_cast %158 : vector<1x32x128xbf16> to vector<32x128xbf16>
    %cst_120 = arith.constant dense<0.000000e+00> : vector<64x128xf32>
    %160 = tpu.matmul %157, %159, %cst_120 {dimension_numbers = #tpu.dot_dimension_numbers<[1], [0], [0], [1], [0, 0, 1, 1], [], []>} : vector<64x32xbf16>, vector<32x128xbf16>, vector<64x128xf32> -> vector<64x128xf32>
    %161 = arith.addf %156, %160 : vector<64x128xf32>
    %162 = vector.broadcast %112 : vector<1x128xf32> to vector<64x128xf32>
    %163 = arith.addf %161, %162 : vector<64x128xf32>
    %cst_121 = arith.constant 0.000000e+00 : f32
    %164 = vector.broadcast %cst_121 : f32 to vector<64x128xf32>
    %165 = arith.maximumf %163, %164 : vector<64x128xf32>
    %166 = arith.truncf %165 : vector<64x128xf32> to vector<64x128xbf16>
    %c0_122 = arith.constant 0 : index
    %c0_123 = arith.constant 0 : index
    %167 = vector.load %arg10[%c0_122, %c0_123] : memref<128x8xbf16, #tpu.memory_space<vmem>>, vector<128x8xbf16>
    %cst_124 = arith.constant dense<0.000000e+00> : vector<64x8xf32>
    %168 = tpu.matmul %166, %167, %cst_124 {dimension_numbers = #tpu.dot_dimension_numbers<[1], [0], [0], [1], [0, 0, 1, 1], [], []>} : vector<64x128xbf16>, vector<128x8xbf16>, vector<64x8xf32> -> vector<64x8xf32>
    %c0_125 = arith.constant 0 : index
    %c0_126 = arith.constant 0 : index
    %169 = vector.load %arg11[%c0_125, %c0_126] : memref<1x8xf32, #tpu.memory_space<vmem>>, vector<1x8xf32>
    %170 = vector.broadcast %169 : vector<1x8xf32> to vector<64x8xf32>
    %171 = arith.addf %168, %170 : vector<64x8xf32>
    %c0_127 = arith.constant 0 : index
    %c0_128 = arith.constant 0 : index
    %c0_129 = arith.constant 0 : index
    %172 = vector.load %arg12[%c0_127, %c0_128, %c0_129] : memref<1x64x8xf32, #tpu.memory_space<vmem>>, vector<1x64x8xf32>
    %173 = vector.shape_cast %172 : vector<1x64x8xf32> to vector<64x8xf32>
    %174 = vector.shape_cast %171 : vector<64x8xf32> to vector<1x64x8xf32>
    tpu.vector_store %arg12[%c0_127, %c0_128, %c0_129], %174 {strides = array<i32>} : memref<1x64x8xf32, #tpu.memory_space<vmem>>, vector<1x64x8xf32>,
    return
  }
  func.func @transform_0(%arg0: i32) -> (i32, i32, i32) {
    %c0_i32 = arith.constant 0 : i32
    %c0_i32_0 = arith.constant 0 : i32
    %c0_i32_1 = arith.constant 0 : i32
    return %arg0, %c0_i32, %c0_i32_0 : i32, i32, i32
  }
  func.func @transform_1(%arg0: i32) -> (i32, i32) {
    %c0_i32 = arith.constant 0 : i32
    %c0_i32_0 = arith.constant 0 : i32
    %c0_i32_1 = arith.constant 0 : i32
    return %c0_i32, %c0_i32_0 : i32, i32
  }
  func.func @transform_2(%arg0: i32) -> (i32, i32, i32) {
    %c0_i32 = arith.constant 0 : i32
    %c0_i32_0 = arith.constant 0 : i32
    %c0_i32_1 = arith.constant 0 : i32
    %c0_i32_2 = arith.constant 0 : i32
    return %c0_i32, %c0_i32_0, %c0_i32_1 : i32, i32, i32
  }
  func.func @transform_3(%arg0: i32) -> (i32, i32) {
    %c0_i32 = arith.constant 0 : i32
    %c0_i32_0 = arith.constant 0 : i32
    %c0_i32_1 = arith.constant 0 : i32
    return %c0_i32, %c0_i32_0 : i32, i32
  }
  func.func @transform_4(%arg0: i32) -> (i32, i32) {
    %c0_i32 = arith.constant 0 : i32
    %c0_i32_0 = arith.constant 0 : i32
    %c0_i32_1 = arith.constant 0 : i32
    return %c0_i32, %c0_i32_0 : i32, i32
  }
  func.func @transform_5(%arg0: i32) -> (i32, i32, i32) {
    %c0_i32 = arith.constant 0 : i32
    %c0_i32_0 = arith.constant 0 : i32
    %c0_i32_1 = arith.constant 0 : i32
    %c0_i32_2 = arith.constant 0 : i32
    return %c0_i32, %c0_i32_0, %c0_i32_1 : i32, i32, i32
  }
  func.func @transform_6(%arg0: i32) -> (i32, i32) {
    %c0_i32 = arith.constant 0 : i32
    %c0_i32_0 = arith.constant 0 : i32
    %c0_i32_1 = arith.constant 0 : i32
    return %c0_i32, %c0_i32_0 : i32, i32
  }
  func.func @transform_7(%arg0: i32) -> (i32, i32, i32) {
    %c0_i32 = arith.constant 0 : i32
    %c0_i32_0 = arith.constant 0 : i32
    %c0_i32_1 = arith.constant 0 : i32
    %c0_i32_2 = arith.constant 0 : i32
    return %c0_i32, %c0_i32_0, %c0_i32_1 : i32, i32, i32
  }
  func.func @transform_8(%arg0: i32) -> (i32, i32) {
    %c0_i32 = arith.constant 0 : i32
    %c0_i32_0 = arith.constant 0 : i32
    %c0_i32_1 = arith.constant 0 : i32
    return %c0_i32, %c0_i32_0 : i32, i32
  }
  func.func @transform_9(%arg0: i32) -> (i32, i32) {
    %c0_i32 = arith.constant 0 : i32
    %c0_i32_0 = arith.constant 0 : i32
    %c0_i32_1 = arith.constant 0 : i32
    return %c0_i32, %c0_i32_0 : i32, i32
  }
  func.func @transform_10(%arg0: i32) -> (i32, i32) {
    %c0_i32 = arith.constant 0 : i32
    %c0_i32_0 = arith.constant 0 : i32
    %c0_i32_1 = arith.constant 0 : i32
    return %c0_i32, %c0_i32_0 : i32, i32
  }
  func.func @transform_11(%arg0: i32) -> (i32, i32, i32) {
    %c0_i32 = arith.constant 0 : i32
    %c0_i32_0 = arith.constant 0 : i32
    %c0_i32_1 = arith.constant 0 : i32
    return %arg0, %c0_i32, %c0_i32_0 : i32, i32, i32
  }
}

</mosaic_0001>

<bundles_post_ra>
// kernel: backbone_with_head_forward.1
= control target key start
LH: loop header
LB: loop body
LE: loop exit
PB: predicated region body
PF: predicated region fallthrough
CT: control target
= control target key end

     0   :  { %s6789_s17 = smov 0   ;;  %s7764_s0 = inlined_call_operand.vmem [shape: bf16[2,256,8], index: 0, kind: input, shape index: {}]   ;;  %s7765_s1 = inlined_call_operand.vmem [shape: bf16[576,256], index: 1, kind: input, shape index: {}]   ;;  %s7766_s2 = inlined_call_operand.vmem [shape: bf16[9,8,16], index: 2, kind: input, shape index: {}]   ;;  %s7767_s3 = inlined_call_operand.vmem [shape: f32[1,16], index: 3, kind: input, shape index: {}]   ;;  %s7768_s4 = inlined_call_operand.vmem [shape: bf16[576,64], index: 4, kind: input, shape index: {}]   ;;  %s7769_s5 = inlined_call_operand.vmem [shape: bf16[9,16,32], index: 5, kind: input, shape index: {}]   ;;  %s7770_s6 = inlined_call_operand.vmem [shape: f32[1,32], index: 6, kind: input, shape index: {}]   ;;  %s7771_s7 = inlined_call_operand.vmem [shape: bf16[9,32,128], index: 7, kind: input, shape index: {}]   ;;  %s7772_s8 = inlined_call_operand.vmem [shape: f32[1,128], index: 8, kind: input, shape index: {}]   ;;  %s7773_s9 = inlined_call_operand.vmem [shape: bf16[128,8], index: 9, kind: input, shape index: {}]   ;;  %s7774_s10 = inlined_call_operand.vmem [shape: f32[1,8], index: 10, kind: input, shape index: {}]   ;;  %s7775_s11 = inlined_call_operand.vmem [shape: f32[2,64,8], index: 11, kind: output, shape index: {}]  }
   0x1 LB: > { %s5187_s18 = sadd.s32 4294967295, %s6726_s17   ;;  %p5191_p0 = scmp.ge.s32.totalorder %s6726_s17, 1  ;;  %s6726_s17 = sphi %s6789_s17, %s21_s17  }
   0x2   : > { %p337_p1 = scmp.lt.s32.totalorder %s6726_s17, 3 }
   0x4   : > { %p338_p2 = pnand %p5191_p0, %p337_p1 }
   0x6   : > { %341 = sbr.rel (%p338_p2) target bundleno = 2216 (0x8a8), region = 64 }
   0xd   : > { %p377_p3 = scmp.lt.s32.totalorder %s5187_s18, 1  ;;  %v6728_v0 = vmov 0   ;;  %v6543_v1 = vld [vmem:[%s7765_s1 + $0x4] ss:$8 sps:$4 sm:$0xff]   ;;  %v6541_v18 = vld [vmem:[%s7765_s1] ss:$8 sps:$4 sm:$0xff]  }
   0xe   : > { %949 = vmatprep.subr.bf16.mxu0 %v6728_v0  ;;  %981 = vmatprep.mubr.bf16.mxu0 %v6543_v1  ;;  %v6544_v19 = vld [vmem:[%s7765_s1 + $0x14] ss:$8 sps:$4 sm:$0xff]   ;;  %v6546_v20 = vld [vmem:[%s7765_s1 + $0x10] ss:$8 sps:$4 sm:$0xff]   ;;  %v6547_v21 = vld [vmem:[%s7765_s1 + $0x24] ss:$8 sps:$4 sm:$0xff]  }
   0xf   : > { %s7787_s18 = smov (!%p377_p3, %s5187_s18), 1  ;;  %v6549_v22 = vld [vmem:[%s7765_s1 + $0x20] ss:$8 sps:$4 sm:$0xff]   ;;  %v6550_v23 = vld [vmem:[%s7765_s1 + $0x34] ss:$8 sps:$4 sm:$0xff]   ;;  %vm1322_vm0 = vcmask 1043456  }
  0x10   : > { %s5597_s21 = sshll.u32 %s7787_s18, 7  ;;  %v6552_v24 = vld [vmem:[%s7765_s1 + $0x30] ss:$8 sps:$4 sm:$0xff]   ;;  %v6553_v25 = vld [vmem:[%s7765_s1 + $0x44] ss:$8 sps:$4 sm:$0xff]   ;;  %vm1309_vm1 = vcmask 64512  }
  0x11   : > { %s6806_s24 = scalar_lea.vmem %s7764_s0, %s5597_s21  ;;  %v6555_v26 = vld [vmem:[%s7765_s1 + $0x40] ss:$8 sps:$4 sm:$0xff]   ;;  %v6556_v27 = vld [vmem:[%s7765_s1 + $0x54] ss:$8 sps:$4 sm:$0xff]   ;;  %v6558_v28 = vld [vmem:[%s7765_s1 + $0x50] ss:$8 sps:$4 sm:$0xff]  }
  0x12   : > { %v6525_v2 = vld [vmem:[%s6806_s24] sm:$0xff]   ;;  %v6526_v3 = vld [vmem:[%s6806_s24 + $0x8] sm:$0xff]   ;;  %v6527_v4 = vld [vmem:[%s6806_s24 + $0x10] sm:$0xff]   ;;  %vm2380_vm2 = vcmask 523264   ;;  %vm2857_vm3 = vcmask 130048   ;;  %vm4081_vm4 = vcmask 261120  }
  0x13   : > { %950 = vmatpush1.bf16.msra.mxu0 %v6525_v2  ;;  %v6528_v5 = vld [vmem:[%s6806_s24 + $0x18] sm:$0xff]   ;;  %v6529_v6 = vld [vmem:[%s6806_s24 + $0x20] sm:$0xff]   ;;  %v6530_v7 = vld [vmem:[%s6806_s24 + $0x28] sm:$0xff]   ;;  %s5598_s27 = sshll.u32 %s7787_s18, 6 }
  0x14   : > { %951 = vmatprep.subr.bf16.mxu0 %v6728_v0  ;;  %v6531_v8 = vld [vmem:[%s6806_s24 + $0x30] sm:$0xff]   ;;  %v6532_v9 = vld [vmem:[%s6806_s24 + $0x38] sm:$0xff]   ;;  %v6533_v10 = vld [vmem:[%s6806_s24 + $0x40] sm:$0xff]   ;;  %s386_s13 = scalar_lea.vmem %s7775_s11, %s5598_s27 }
  0x15   : > { %v6534_v11 = vld [vmem:[%s6806_s24 + $0x48] sm:$0xff]   ;;  %v6535_v12 = vld [vmem:[%s6806_s24 + $0x50] sm:$0xff]   ;;  %v6536_v13 = vld [vmem:[%s6806_s24 + $0x58] sm:$0xff]  }
  0x16   : > { %v6537_v14 = vld [vmem:[%s6806_s24 + $0x60] sm:$0xff]   ;;  %v6538_v15 = vld [vmem:[%s6806_s24 + $0x68] sm:$0xff]   ;;  %v6539_v16 = vld [vmem:[%s6806_s24 + $0x70] sm:$0xff]  }
  0x17   : > { %952 = vmatpush1.bf16.msra.mxu0 %v6526_v3  ;;  %v6540_v17 = vld [vmem:[%s6806_s24 + $0x78] sm:$0xff]   ;;  %v6559_v29 = vld [vmem:[%s7765_s1 + $0x64] ss:$8 sps:$4 sm:$0xff]   ;;  %v6561_v30 = vld [vmem:[%s7765_s1 + $0x60] ss:$8 sps:$4 sm:$0xff]  }
  0x18   : > { %953 = vmatprep.subr.bf16.mxu0 %v6728_v0  ;;  %v6562_v31 = vld [vmem:[%s7765_s1 + $0x74] ss:$8 sps:$4 sm:$0xff]   ;;  %v6564_v32 = vld [vmem:[%s7765_s1 + $0x70] ss:$8 sps:$4 sm:$0xff]   ;;  %v6565_v33 = vld [vmem:[%s7765_s1 + $0x84] ss:$8 sps:$4 sm:$0xff]  }
  0x19   : > { %v6567_v34 = vld [vmem:[%s7765_s1 + $0x80] ss:$8 sps:$4 sm:$0xff]   ;;  %v6568_v35 = vld [vmem:[%s7765_s1 + $0x94] ss:$8 sps:$4 sm:$0xff]   ;;  %v6570_v36 = vld [vmem:[%s7765_s1 + $0x90] ss:$8 sps:$4 sm:$0xff]  }
  0x1a   : > { %v6571_v37 = vld [vmem:[%s7765_s1 + $0xa4] ss:$8 sps:$4 sm:$0xff]   ;;  %v6573_v38 = vld [vmem:[%s7765_s1 + $0xa0] ss:$8 sps:$4 sm:$0xff]   ;;  %v6574_v39 = vld [vmem:[%s7765_s1 + $0xb4] ss:$8 sps:$4 sm:$0xff]  }
  0x1b   : > { %954 = vmatpush1.bf16.msra.mxu0 %v6527_v4  ;;  %v6576_v40 = vld [vmem:[%s7765_s1 + $0xb0] ss:$8 sps:$4 sm:$0xff]   ;;  %v6577_v41 = vld [vmem:[%s7765_s1 + $0xc4] ss:$8 sps:$4 sm:$0xff]   ;;  %v6579_v42 = vld [vmem:[%s7765_s1 + $0xc0] ss:$8 sps:$4 sm:$0xff]  }
  0x1c   : > { %955 = vmatprep.subr.bf16.mxu0 %v6728_v0  ;;  %v6580_v43 = vld [vmem:[%s7765_s1 + $0xd4] ss:$8 sps:$4 sm:$0xff]   ;;  %v6582_v44 = vld [vmem:[%s7765_s1 + $0xd0] ss:$8 sps:$4 sm:$0xff]   ;;  %v6583_v45 = vld [vmem:[%s7765_s1 + $0xe4] ss:$8 sps:$4 sm:$0xff]  }
  0x1d   : > { %v6585_v46 = vld [vmem:[%s7765_s1 + $0xe0] ss:$8 sps:$4 sm:$0xff]   ;;  %v6586_v47 = vld [vmem:[%s7765_s1 + $0xf4] ss:$8 sps:$4 sm:$0xff]   ;;  %v6588_v48 = vld [vmem:[%s7765_s1 + $0xf0] ss:$8 sps:$4 sm:$0xff]  }
  0x1e   : > { %v6589_v49 = vld [vmem:[%s7765_s1 + $0x104] ss:$8 sps:$4 sm:$0xff]   ;;  %v6591_v51 = vld [vmem:[%s7765_s1 + $0x100] ss:$8 sps:$4 sm:$0xff]   ;;  %v6592_v53 = vld [vmem:[%s7765_s1 + $0x114] ss:$8 sps:$4 sm:$0xff]  }
  0x1f   : > { %956 = vmatpush1.bf16.msra.mxu0 %v6528_v5  ;;  %v5284_v50 = vld [vmem:[%s7766_s2 + $0x4] sm:$0xf]  ;;  %v6594_v54 = vld [vmem:[%s7765_s1 + $0x110] ss:$8 sps:$4 sm:$0xff]   ;;  %v6597_v56 = vld [vmem:[%s7765_s1 + $0x120] ss:$8 sps:$4 sm:$0xff]  }
  0x20   : > { %957 = vmatprep.subr.bf16.mxu0 %v6728_v0  ;;  %6507 = vmatprep.subr.msk.bf16.mxu1 %vm1322_vm0, %v5284_v50  ;;  %v1324_v52 = vsel %vm1322_vm0, %v5284_v50, 0  ;;  %v6595_v55 = vld [vmem:[%s7765_s1 + $0x124] ss:$8 sps:$4 sm:$0xff]   ;;  %v6598_v57 = vld [vmem:[%s7765_s1 + $0x134] ss:$8 sps:$4 sm:$0xff]  }
  0x21   : > { %5836 = vmatpush3.bf16.msra.mxu1 %v1324_v52  ;;  %v6946_v58 = vld [vmem:[%s7766_s2] sm:$0xf]  ;;  %v6600_v59 = vld [vmem:[%s7765_s1 + $0x130] ss:$8 sps:$4 sm:$0xff]   ;;  %v6601_v60 = vld [vmem:[%s7765_s1 + $0x144] ss:$8 sps:$4 sm:$0xff]  }
  0x22   : > { %6508 = vmatprep.subr.msk.bf16.mxu1 %vm1322_vm0, %v6946_v58  ;;  %v6603_v61 = vld [vmem:[%s7765_s1 + $0x140] ss:$8 sps:$4 sm:$0xff]   ;;  %v6604_v62 = vld [vmem:[%s7765_s1 + $0x154] ss:$8 sps:$4 sm:$0xff]   ;;  %v6606_v63 = vld [vmem:[%s7765_s1 + $0x150] ss:$8 sps:$4 sm:$0xff]  }
  0x23   : > { %958 = vmatpush1.bf16.msra.mxu0 %v6529_v6  ;;  %v6609_v1 = vld [vmem:[%s7765_s1 + $0x160] ss:$8 sps:$4 sm:$0xff]   ;;  %v6610_v2 = vld [vmem:[%s7765_s1 + $0x174] ss:$8 sps:$4 sm:$0xff]   ;;  %v6612_v3 = vld [vmem:[%s7765_s1 + $0x170] ss:$8 sps:$4 sm:$0xff]  }
  0x24   : > { %959 = vmatprep.subr.bf16.mxu0 %v6728_v0  ;;  %v6613_v4 = vld [vmem:[%s7765_s1 + $0x184] ss:$8 sps:$4 sm:$0xff]   ;;  %v6615_v5 = vld [vmem:[%s7765_s1 + $0x180] ss:$8 sps:$4 sm:$0xff]   ;;  %v6616_v6 = vld [vmem:[%s7765_s1 + $0x194] ss:$8 sps:$4 sm:$0xff]  }
  0x25   : > { %v6640_v50 = vld [vmem:[%s7765_s1 + $0x214] ss:$8 sps:$4 sm:$0xff]  }
  0x27   : > { %960 = vmatpush1.bf16.msra.mxu0 %v6530_v7  ;;  %v6618_v7 = vld [vmem:[%s7765_s1 + $0x190] ss:$8 sps:$4 sm:$0xff]  }
  0x28   : > { %961 = vmatprep.subr.bf16.mxu0 %v6728_v0 }
  0x2b   : > { %962 = vmatpush1.bf16.msra.mxu0 %v6531_v8  ;;  %v6619_v8 = vld [vmem:[%s7765_s1 + $0x1a4] ss:$8 sps:$4 sm:$0xff]  }
  0x2c   : > { %963 = vmatprep.subr.bf16.mxu0 %v6728_v0 }
  0x2f   : > { %964 = vmatpush1.bf16.msra.mxu0 %v6532_v9  ;;  %v6621_v9 = vld [vmem:[%s7765_s1 + $0x1a0] ss:$8 sps:$4 sm:$0xff]  }
  0x30   : > { %965 = vmatprep.subr.bf16.mxu0 %v6728_v0 }
  0x33   : > { %966 = vmatpush1.bf16.msra.mxu0 %v6533_v10  ;;  %v6622_v10 = vld [vmem:[%s7765_s1 + $0x1b4] ss:$8 sps:$4 sm:$0xff]  }
  0x34   : > { %967 = vmatprep.subr.bf16.mxu0 %v6728_v0 }
  0x37   : > { %968 = vmatpush1.bf16.msra.mxu0 %v6534_v11 }
  0x38   : > { %969 = vmatprep.subr.bf16.mxu0 %v6728_v0 }
  0x3b   : > { %970 = vmatpush1.bf16.msra.mxu0 %v6535_v12 }
  0x3c   : > { %971 = vmatprep.subr.bf16.mxu0 %v6728_v0 }
  0x3f   : > { %972 = vmatpush1.bf16.msra.mxu0 %v6536_v13  ;;  %v6624_v13 = vld [vmem:[%s7765_s1 + $0x1b0] ss:$8 sps:$4 sm:$0xff]  }
  0x40   : > { %973 = vmatprep.subr.bf16.mxu0 %v6728_v0 }
  0x43   : > { %974 = vmatpush1.bf16.msra.mxu0 %v6537_v14 }
  0x44   : > { %975 = vmatprep.subr.bf16.mxu0 %v6728_v0 }
  0x47   : > { %976 = vmatpush1.bf16.msra.mxu0 %v6538_v15  ;;  %v6625_v15 = vld [vmem:[%s7765_s1 + $0x1c4] ss:$8 sps:$4 sm:$0xff]  }
  0x48   : > { %977 = vmatprep.subr.bf16.mxu0 %v6728_v0 }
  0x4b   : > { %978 = vmatpush1.bf16.msra.mxu0 %v6539_v16 }
  0x4c   : > { %979 = vmatprep.subr.bf16.mxu0 %v6728_v0  ;;  %v6607_v0 = vld [vmem:[%s7765_s1 + $0x164] ss:$8 sps:$4 sm:$0xff]  }
  0x4f   : > { %980 = vmatpush1.bf16.msra.mxu0 %v6540_v17 }
  0x52   : > { %982 = vmatmul.mubr.bf16.vlgmr.msra.gmra.mrb[0].mxu0 %v6541_v18 }
  0x53   : > { %989 = vmatprep.mubr.bf16.mxu0 %v6544_v19 }
  0x5a   : > { %990 = vmatmul.mubr.bf16.gmra.mrb[4].mxu0 %v6546_v20  ;;  %v6627_v20 = vld [vmem:[%s7765_s1 + $0x1c0] ss:$8 sps:$4 sm:$0xff]  }
  0x5b   : > { %997 = vmatprep.mubr.bf16.mxu0 %v6547_v21 }
  0x62   : > { %998 = vmatmul.mubr.bf16.gmra.mrb[8].mxu0 %v6549_v22  ;;  %v6628_v22 = vld [vmem:[%s7765_s1 + $0x1d4] ss:$8 sps:$4 sm:$0xff]  }
  0x63   : > { %1005 = vmatprep.mubr.bf16.mxu0 %v6550_v23 }
  0x6a   : > { %1006 = vmatmul.mubr.bf16.gmra.mrb[12].mxu0 %v6552_v24 }
  0x6b   : > { %1013 = vmatprep.mubr.bf16.mxu0 %v6553_v25 }
  0x72   : > { %1014 = vmatmul.mubr.bf16.gmra.mrb[16].mxu0 %v6555_v26 }
  0x73   : > { %1021 = vmatprep.mubr.bf16.mxu0 %v6556_v27  ;;  %v6630_v27 = vld [vmem:[%s7765_s1 + $0x1d0] ss:$8 sps:$4 sm:$0xff]  }
  0x7a   : > { %1022 = vmatmul.mubr.bf16.gmra.mrb[20].mxu0 %v6558_v28 }
  0x7b   : > { %1029 = vmatprep.mubr.bf16.mxu0 %v6559_v29  ;;  %v6631_v29 = vld [vmem:[%s7765_s1 + $0x1e4] ss:$8 sps:$4 sm:$0xff]  }
  0x82   : > { %1030 = vmatmul.mubr.bf16.gmra.mrb[24].mxu0 %v6561_v30 }
  0x83   : > { %1037 = vmatprep.mubr.bf16.mxu0 %v6562_v31 }
  0x8a   : > { %1038 = vmatmul.mubr.bf16.gmra.mrb[28].mxu0 %v6564_v32 }
  0x8b   : > { %1045 = vmatprep.mubr.bf16.mxu0 %v6565_v33 }
  0x92   : > { %1046 = vmatmul.mubr.bf16.gmra.mrb[32].mxu0 %v6567_v34  ;;  %v6633_v34 = vld [vmem:[%s7765_s1 + $0x1e0] ss:$8 sps:$4 sm:$0xff]  }
  0x93   : > { %1053 = vmatprep.mubr.bf16.mxu0 %v6568_v35 }
  0x9a   : > { %1054 = vmatmul.mubr.bf16.gmra.mrb[36].mxu0 %v6570_v36  ;;  %v6634_v36 = vld [vmem:[%s7765_s1 + $0x1f4] ss:$8 sps:$4 sm:$0xff]  }
  0x9b   : > { %1061 = vmatprep.mubr.bf16.mxu0 %v6571_v37 }
  0xa2   : > { %1062 = vmatmul.mubr.bf16.gmra.mrb[40].mxu0 %v6573_v38 }
  0xa3   : > { %1069 = vmatprep.mubr.bf16.mxu0 %v6574_v39 }
  0xaa   : > { %1070 = vmatmul.mubr.bf16.gmra.mrb[44].mxu0 %v6576_v40 }
  0xab   : > { %1077 = vmatprep.mubr.bf16.mxu0 %v6577_v41  ;;  %v6636_v41 = vld [vmem:[%s7765_s1 + $0x1f0] ss:$8 sps:$4 sm:$0xff]  }
  0xb2   : > { %1078 = vmatmul.mubr.bf16.gmra.mrb[48].mxu0 %v6579_v42 }
  0xb3   : > { %1085 = vmatprep.mubr.bf16.mxu0 %v6580_v43  ;;  %v6637_v43 = vld [vmem:[%s7765_s1 + $0x204] ss:$8 sps:$4 sm:$0xff]  }
  0xba   : > { %1086 = vmatmul.mubr.bf16.gmra.mrb[52].mxu0 %v6582_v44 }
  0xbb   : > { %1093 = vmatprep.mubr.bf16.mxu0 %v6583_v45 }
  0xc2   : > { %1094 = vmatmul.mubr.bf16.gmra.mrb[56].mxu0 %v6585_v46 }
  0xc3   : > { %1101 = vmatprep.mubr.bf16.mxu0 %v6586_v47 }
  0xca   : > { %1102 = vmatmul.mubr.bf16.gmra.mrb[60].mxu0 %v6588_v48  ;;  %v6639_v48 = vld [vmem:[%s7765_s1 + $0x200] ss:$8 sps:$4 sm:$0xff]  }
  0xcb   : > { %1109 = vmatprep.mubr.bf16.mxu0 %v6589_v49 }
  0xd2   : > { %1110 = vmatmul.mubr.bf16.gmra.mrb[64].mxu0 %v6591_v51 }
  0xd3   : > { %1117 = vmatprep.mubr.bf16.mxu0 %v6592_v53  ;;  %v1404_v53 = vsel %vm1322_vm0, %v6946_v58, 0  ;;  %v6643_v58 = vld [vmem:[%s7765_s1 + $0x224] ss:$8 sps:$4 sm:$0xff]  }
  0xda   : > { %1118 = vmatmul.mubr.bf16.gmra.mrb[68].mxu0 %v6594_v54  ;;  %v5293_v54 = vld [vmem:[%s7766_s2 + $0x8] sm:$0xf] }
  0xdb   : > { %1125 = vmatprep.mubr.bf16.mxu0 %v6595_v55 }
  0xe2   : > { %1126 = vmatmul.mubr.bf16.gmra.mrb[72].mxu0 %v6597_v56 }
  0xe3   : > { %1133 = vmatprep.mubr.bf16.mxu0 %v6598_v57  ;;  %v6642_v57 = vld [vmem:[%s7765_s1 + $0x210] ss:$8 sps:$4 sm:$0xff]  }
  0xea   : > { %1134 = vmatmul.mubr.bf16.gmra.mrb[76].mxu0 %v6600_v59 }
  0xeb   : > { %1141 = vmatprep.mubr.bf16.mxu0 %v6601_v60 }
  0xf2   : > { %1142 = vmatmul.mubr.bf16.gmra.mrb[80].mxu0 %v6603_v61 }
  0xf3   : > { %1149 = vmatprep.mubr.bf16.mxu0 %v6604_v62 }
  0xfa   : > { %1150 = vmatmul.mubr.bf16.gmra.mrb[84].mxu0 %v6606_v63 }
  0xfb   : > { %1157 = vmatprep.mubr.bf16.mxu0 %v6607_v0  ;;  %v6645_v0 = vld [vmem:[%s7765_s1 + $0x220] ss:$8 sps:$4 sm:$0xff]  }
 0x102   : > { %1158 = vmatmul.mubr.bf16.gmra.mrb[88].mxu0 %v6609_v1 }
 0x103   : > { %1165 = vmatprep.mubr.bf16.mxu0 %v6610_v2  ;;  %v6646_v2 = vld [vmem:[%s7765_s1 + $0x234] ss:$8 sps:$4 sm:$0xff]  }
 0x10a   : > { %1166 = vmatmul.mubr.bf16.gmra.mrb[92].mxu0 %v6612_v3 }
 0x10b   : > { %1173 = vmatprep.mubr.bf16.mxu0 %v6613_v4 }
 0x112   : > { %1174 = vmatmul.mubr.bf16.gmra.mrb[96].mxu0 %v6615_v5 }
 0x113   : > { %1181 = vmatprep.mubr.bf16.mxu0 %v6616_v6 }
 0x11a   : > { %1182 = vmatmul.mubr.bf16.gmra.mrb[100].mxu0 %v6618_v7  ;;  %v6648_v7 = vld [vmem:[%s7765_s1 + $0x230] ss:$8 sps:$4 sm:$0xff]  }
 0x11b   : > { %1189 = vmatprep.mubr.bf16.mxu0 %v6619_v8 }
 0x122   : > { %1190 = vmatmul.mubr.bf16.gmra.mrb[104].mxu0 %v6621_v9 }
 0x123   : > { %1197 = vmatprep.mubr.bf16.mxu0 %v6622_v10 }
 0x125   : > { %v6998_v11 = vpop.f32.mrb[0].mxu0 }
 0x126   : > { %v985_v12 = vpop.f32.mrb[1].mxu0 }
 0x127   : > { %v7003_v14 = vpop.f32.mrb[2].mxu0  ;;  %v1486_v12 = vsel %vm1322_vm0, %v5293_v54, 0 }
 0x128   : > { %v1270_v16 = vpack.c.bf16 %v7003_v14, %v6998_v11  ;;  %v988_v17 = vpop.f32.mrb[3].mxu0 }
 0x12a   : > { %1198 = vmatmul.mubr.bf16.gmra.mrb[108].mxu0 %v6624_v13  ;;  %v5298_v13 = vld [vmem:[%s7766_s2 + $0xc] sm:$0xf] }
 0x12b   : > { %1205 = vmatprep.mubr.bf16.mxu0 %v6625_v15 }
 0x12d   : > { %v7010_v18 = vpop.f32.mrb[4].mxu0 }
 0x12e   : > { %v993_v19 = vpop.f32.mrb[5].mxu0 }
 0x12f   : > { %v7015_v21 = vpop.f32.mrb[6].mxu0 }
 0x130   : > { %v1271_v23 = vpack.c.bf16 %v7015_v21, %v7010_v18  ;;  %v996_v24 = vpop.f32.mrb[7].mxu0 }
 0x131   : > { %v5303_v24 = vld [vmem:[%s7766_s2 + $0x10] sm:$0xf] }
 0x132   : > { %1206 = vmatmul.mubr.bf16.gmra.mrb[112].mxu0 %v6627_v20 }
 0x133   : > { %1213 = vmatprep.mubr.bf16.mxu0 %v6628_v22 }
 0x135   : > { %v7022_v25 = vpop.f32.mrb[8].mxu0 }
 0x136   : > { %v1001_v26 = vpop.f32.mrb[9].mxu0 }
 0x137   : > { %v7027_v28 = vpop.f32.mrb[10].mxu0 }
 0x138   : > { %v1272_v30 = vpack.c.bf16 %v7027_v28, %v7022_v25  ;;  %v1004_v31 = vpop.f32.mrb[11].mxu0 }
 0x13a   : > { %1214 = vmatmul.mubr.bf16.gmra.mrb[116].mxu0 %v6630_v27 }
 0x13b   : > { %1221 = vmatprep.mubr.bf16.mxu0 %v6631_v29 }
 0x13d   : > { %v7034_v32 = vpop.f32.mrb[12].mxu0 }
 0x13e   : > { %v1009_v33 = vpop.f32.mrb[13].mxu0 }
 0x13f   : > { %v7039_v35 = vpop.f32.mrb[14].mxu0 }
 0x140   : > { %v1273_v37 = vpack.c.bf16 %v7039_v35, %v7034_v32  ;;  %v1012_v38 = vpop.f32.mrb[15].mxu0 }
 0x142   : > { %1222 = vmatmul.mubr.bf16.gmra.mrb[120].mxu0 %v6633_v34 }
 0x143   : > { %1229 = vmatprep.mubr.bf16.mxu0 %v6634_v36 }
 0x145   : > { %v1015_v39 = vpop.f32.mrb[16].mxu0 }
 0x146   : > { %v1017_v40 = vpop.f32.mrb[17].mxu0 }
 0x147   : > { %v1018_v42 = vpop.f32.mrb[18].mxu0  ;;  %v1666_v40 = vsel %vm1322_vm0, %v5303_v24, 0 }
 0x148   : > { %v1274_v44 = vpack.c.bf16 %v1018_v42, %v1015_v39  ;;  %v1020_v45 = vpop.f32.mrb[19].mxu0 }
 0x14a   : > { %1230 = vmatmul.mubr.bf16.gmra.mrb[124].mxu0 %v6636_v41  ;;  %5837 = vmatprep.mubr.msk.bf16.mxu1 %vm1309_vm1, %v1274_v44  ;;  %v5308_v41 = vld [vmem:[%s7766_s2 + $0x14] sm:$0xf] }
 0x14b   : > { %1237 = vmatprep.mubr.bf16.mxu0 %v6637_v43 }
 0x14d   : > { %v1023_v46 = vpop.f32.mrb[20].mxu0 }
 0x14e   : > { %v1025_v47 = vpop.f32.mrb[21].mxu0 }
 0x14f   : > { %v1026_v49 = vpop.f32.mrb[22].mxu0 }
 0x150   : > { %v1275_v51 = vpack.c.bf16 %v1026_v49, %v1023_v46  ;;  %v1028_v52 = vpop.f32.mrb[23].mxu0 }
 0x152   : > { %1238 = vmatmul.mubr.bf16.gmra.mrb[128].mxu0 %v6639_v48  ;;  %5838 = vmatmul.mubr.msk.bf16.vlgmr.msra.gmra.mrb[0].mxu1 %vm1309_vm1, %v1275_v51 }
 0x153   : > { %1245 = vmatprep.mubr.bf16.mxu0 %v6640_v50  ;;  %5846 = vmatpush3.bf16.msra.mxu1 %v1404_v53 }
 0x154   : > { %6509 = vmatprep.subr.msk.bf16.mxu1 %vm1322_vm0, %v5293_v54 }
 0x155   : > { %v1031_v55 = vpop.f32.mrb[24].mxu0 }
 0x156   : > { %v1033_v56 = vpop.f32.mrb[25].mxu0 }
 0x157   : > { %v1034_v59 = vpop.f32.mrb[26].mxu0 }
 0x158   : > { %v1276_v60 = vpack.c.bf16 %v1034_v59, %v1031_v55  ;;  %v1036_v61 = vpop.f32.mrb[27].mxu0 }
 0x15a   : > { %1246 = vmatmul.mubr.bf16.gmra.mrb[132].mxu0 %v6642_v57  ;;  %5841 = vmatprep.mubr.msk.bf16.mxu1 %vm1309_vm1, %v1276_v60 }
 0x15b   : > { %1253 = vmatprep.mubr.bf16.mxu0 %v6643_v58 }
 0x15d   : > { %v1039_v62 = vpop.f32.mrb[28].mxu0 }
 0x15e   : > { %v1041_v63 = vpop.f32.mrb[29].mxu0 }
 0x15f   : > { %v1042_v1 = vpop.f32.mrb[30].mxu0  ;;  %v5313_v63 = vld [vmem:[%s7766_s2 + $0x18] sm:$0xf] }
 0x160   : > { %v1277_v3 = vpack.c.bf16 %v1042_v1, %v1039_v62  ;;  %v1044_v4 = vpop.f32.mrb[31].mxu0  ;;  %v1756_v62 = vsel %vm1322_vm0, %v5308_v41, 0 }
 0x162   : > { %1254 = vmatmul.mubr.bf16.gmra.mrb[136].mxu0 %v6645_v0  ;;  %5842 = vmatmul.mubr.msk.bf16.gmra.mrb[4].mxu1 %vm1309_vm1, %v1277_v3 }
 0x163   : > { %5847 = vmatprep.mubr.msk.bf16.mxu1 %vm1309_vm1, %v1270_v16  ;;  %1261 = vmatprep.mubr.bf16.mxu0 %v6646_v2 }
 0x165   : > { %v1047_v5 = vpop.f32.mrb[32].mxu0 }
 0x166   : > { %v1049_v6 = vpop.f32.mrb[33].mxu0 }
 0x167   : > { %v1050_v8 = vpop.f32.mrb[34].mxu0 }
 0x168   : > { %v1278_v9 = vpack.c.bf16 %v1050_v8, %v1047_v5  ;;  %v1052_v10 = vpop.f32.mrb[35].mxu0 }
 0x16a   : > { %1262 = vmatmul.mubr.bf16.gmra.mrb[140].mxu0 %v6648_v7  ;;  %5848 = vmatmul.mubr.msk.bf16.vlgmr.msra.gmra.mrb[0].mxu1 %vm1309_vm1, %v1271_v23  ;;  %v1576_v23 = vsel %vm1322_vm0, %v5298_v13, 0 }
 0x16b   : > { %5851 = vmatprep.mubr.msk.bf16.mxu1 %vm1309_vm1, %v1272_v30  ;;  %5856 = vmatpush3.bf16.msra.mxu1 %v1486_v12 }
 0x16c   : > { %6510 = vmatprep.subr.msk.bf16.mxu1 %vm1322_vm0, %v5298_v13 }
 0x16d   : > { %v1055_v11 = vpop.f32.mrb[36].mxu0 }
 0x16e   : > { %v1057_v14 = vpop.f32.mrb[37].mxu0 }
 0x16f   : > { %v1058_v15 = vpop.f32.mrb[38].mxu0 }
 0x170   : > { %v1279_v16 = vpack.c.bf16 %v1058_v15, %v1055_v11  ;;  %v1060_v17 = vpop.f32.mrb[39].mxu0 }
 0x172   : > { %5852 = vmatmul.mubr.msk.bf16.gmra.mrb[4].mxu1 %vm1309_vm1, %v1273_v37 }
 0x173   : > { %5857 = vmatprep.mubr.msk.bf16.mxu1 %vm1309_vm1, %v1278_v9 }
 0x175   : > { %v1063_v18 = vpop.f32.mrb[40].mxu0 }
 0x176   : > { %v1065_v19 = vpop.f32.mrb[41].mxu0 }
 0x177   : > { %v1066_v20 = vpop.f32.mrb[42].mxu0 }
 0x178   : > { %v1280_v21 = vpack.c.bf16 %v1066_v20, %v1063_v18  ;;  %v1068_v22 = vpop.f32.mrb[43].mxu0  ;;  %v1846_v20 = vsel %vm1322_vm0, %v5313_v63, 0 }
 0x17a   : > { %5858 = vmatmul.mubr.msk.bf16.vlgmr.msra.gmra.mrb[0].mxu1 %vm1309_vm1, %v1279_v16 }
 0x17b   : > { %5861 = vmatprep.mubr.msk.bf16.mxu1 %vm1309_vm1, %v1280_v21  ;;  %5866 = vmatpush3.bf16.msra.mxu1 %v1576_v23  ;;  %v5318_v21 = vld [vmem:[%s7766_s2 + $0x1c] sm:$0xf] }
 0x17c   : > { %6511 = vmatprep.subr.msk.bf16.mxu1 %vm1322_vm0, %v5303_v24 }
 0x17d   : > { %v1071_v25 = vpop.f32.mrb[44].mxu0 }
 0x17e   : > { %v1073_v26 = vpop.f32.mrb[45].mxu0 }
 0x17f   : > { %v1074_v27 = vpop.f32.mrb[46].mxu0 }
 0x180   : > { %v1281_v28 = vpack.c.bf16 %v1074_v27, %v1071_v25  ;;  %v1076_v29 = vpop.f32.mrb[47].mxu0 }
 0x182   : > { %5862 = vmatmul.mubr.msk.bf16.gmra.mrb[4].mxu1 %vm1309_vm1, %v1281_v28 }
 0x185   : > { %v1079_v30 = vpop.f32.mrb[48].mxu0 }
 0x186   : > { %v1081_v31 = vpop.f32.mrb[49].mxu0 }
 0x187   : > { %v1082_v32 = vpop.f32.mrb[50].mxu0 }
 0x188   : > { %v1282_v33 = vpack.c.bf16 %v1082_v32, %v1079_v30  ;;  %v1084_v34 = vpop.f32.mrb[51].mxu0 }
 0x18a   : > { %5867 = vmatprep.mubr.msk.bf16.mxu1 %vm1309_vm1, %v1282_v33 }
 0x18d   : > { %v1087_v35 = vpop.f32.mrb[52].mxu0 }
 0x18e   : > { %v1089_v36 = vpop.f32.mrb[53].mxu0 }
 0x18f   : > { %v1090_v37 = vpop.f32.mrb[54].mxu0 }
 0x190   : > { %v1283_v38 = vpack.c.bf16 %v1090_v37, %v1087_v35  ;;  %v1092_v39 = vpop.f32.mrb[55].mxu0 }
 0x192   : > { %5868 = vmatmul.mubr.msk.bf16.vlgmr.msra.gmra.mrb[0].mxu1 %vm1309_vm1, %v1283_v38 }
 0x193   : > { %5876 = vmatpush3.bf16.msra.mxu1 %v1666_v40 }
 0x194   : > { %6512 = vmatprep.subr.msk.bf16.mxu1 %vm1322_vm0, %v5308_v41 }
 0x195   : > { %v1095_v42 = vpop.f32.mrb[56].mxu0 }
 0x196   : > { %v1097_v43 = vpop.f32.mrb[57].mxu0 }
 0x197   : > { %v1098_v44 = vpop.f32.mrb[58].mxu0  ;;  %v5323_v43 = vld [vmem:[%s7766_s2 + $0x20] sm:$0xf] }
 0x198   : > { %v1284_v45 = vpack.c.bf16 %v1098_v44, %v1095_v42  ;;  %v1100_v46 = vpop.f32.mrb[59].mxu0  ;;  %v1936_v42 = vsel %vm1322_vm0, %v5318_v21, 0 }
 0x19a   : > { %5871 = vmatprep.mubr.msk.bf16.mxu1 %vm1309_vm1, %v1284_v45 }
 0x19d   : > { %v1103_v47 = vpop.f32.mrb[60].mxu0 }
 0x19e   : > { %v1105_v48 = vpop.f32.mrb[61].mxu0 }
 0x19f   : > { %v1106_v49 = vpop.f32.mrb[62].mxu0 }
 0x1a0   : > { %v1285_v50 = vpack.c.bf16 %v1106_v49, %v1103_v47  ;;  %v1108_v51 = vpop.f32.mrb[63].mxu0 }
 0x1a2   : > { %5872 = vmatmul.mubr.msk.bf16.gmra.mrb[4].mxu1 %vm1309_vm1, %v1285_v50 }
 0x1a5   : > { %v1111_v52 = vpop.f32.mrb[64].mxu0 }
 0x1a6   : > { %v1113_v53 = vpop.f32.mrb[65].mxu0 }
 0x1a7   : > { %v1114_v54 = vpop.f32.mrb[66].mxu0 }
 0x1a8   : > { %v1286_v55 = vpack.c.bf16 %v1114_v54, %v1111_v52  ;;  %v1116_v56 = vpop.f32.mrb[67].mxu0 }
 0x1aa   : > { %5877 = vmatprep.mubr.msk.bf16.mxu1 %vm1309_vm1, %v1286_v55 }
 0x1ad   : > { %v1119_v57 = vpop.f32.mrb[68].mxu0 }
 0x1ae   : > { %v1121_v59 = vpop.f32.mrb[69].mxu0 }
 0x1af   : > { %v1122_v58 = vpop.f32.mrb[70].mxu0 }
 0x1b0   : > { %v1287_v60 = vpack.c.bf16 %v1122_v58, %v1119_v57  ;;  %v1124_v61 = vpop.f32.mrb[71].mxu0 }
 0x1b2   : > { %5878 = vmatmul.mubr.msk.bf16.vlgmr.msra.gmra.mrb[0].mxu1 %vm1309_vm1, %v1287_v60 }
 0x1b3   : > { %5886 = vmatpush3.bf16.msra.mxu1 %v1756_v62 }
 0x1b4   : > { %6513 = vmatprep.subr.msk.bf16.mxu1 %vm1322_vm0, %v5313_v63 }
 0x1b5   : > { %v1127_v0 = vpop.f32.mrb[72].mxu0 }
 0x1b6   : > { %v1129_v1 = vpop.f32.mrb[73].mxu0 }
 0x1b7   : > { %v1130_v2 = vpop.f32.mrb[74].mxu0 }
 0x1b8   : > { %v1288_v3 = vpack.c.bf16 %v1130_v2, %v1127_v0  ;;  %v1132_v4 = vpop.f32.mrb[75].mxu0  ;;  %v2026_v0 = vsel %vm1322_vm0, %v5323_v43, 0 }
 0x1ba   : > { %5881 = vmatprep.mubr.msk.bf16.mxu1 %vm1309_vm1, %v1288_v3 }
 0x1bd   : > { %v1135_v5 = vpop.f32.mrb[76].mxu0 }
 0x1be   : > { %v1137_v6 = vpop.f32.mrb[77].mxu0 }
 0x1bf   : > { %v1138_v7 = vpop.f32.mrb[78].mxu0 }
 0x1c0   : > { %v1289_v8 = vpack.c.bf16 %v1138_v7, %v1135_v5  ;;  %v1140_v9 = vpop.f32.mrb[79].mxu0 }
 0x1c2   : > { %5882 = vmatmul.mubr.msk.bf16.gmra.mrb[4].mxu1 %vm1309_vm1, %v1289_v8 }
 0x1c5   : > { %v1143_v10 = vpop.f32.mrb[80].mxu0 }
 0x1c6   : > { %v1145_v12 = vpop.f32.mrb[81].mxu0 }
 0x1c7   : > { %v1146_v13 = vpop.f32.mrb[82].mxu0 }
 0x1c8   : > { %v1290_v11 = vpack.c.bf16 %v1146_v13, %v1143_v10  ;;  %v1148_v14 = vpop.f32.mrb[83].mxu0 }
 0x1ca   : > { %5887 = vmatprep.mubr.msk.bf16.mxu1 %vm1309_vm1, %v1290_v11 }
 0x1cd   : > { %v1151_v15 = vpop.f32.mrb[84].mxu0 }
 0x1ce   : > { %v1153_v16 = vpop.f32.mrb[85].mxu0 }
 0x1cf   : > { %v1154_v17 = vpop.f32.mrb[86].mxu0 }
 0x1d0   : > { %v1291_v18 = vpack.c.bf16 %v1154_v17, %v1151_v15  ;;  %v1156_v19 = vpop.f32.mrb[87].mxu0 }
 0x1d2   : > { %5888 = vmatmul.mubr.msk.bf16.vlgmr.msra.gmra.mrb[0].mxu1 %vm1309_vm1, %v1291_v18 }
 0x1d3   : > { %5896 = vmatpush3.bf16.msra.mxu1 %v1846_v20 }
 0x1d4   : > { %6514 = vmatprep.subr.msk.bf16.mxu1 %vm1322_vm0, %v5318_v21 }
 0x1d5   : > { %v1159_v22 = vpop.f32.mrb[88].mxu0 }
 0x1d6   : > { %v1161_v23 = vpop.f32.mrb[89].mxu0 }
 0x1d7   : > { %v1162_v24 = vpop.f32.mrb[90].mxu0 }
 0x1d8   : > { %v1292_v25 = vpack.c.bf16 %v1162_v24, %v1159_v22  ;;  %v1164_v26 = vpop.f32.mrb[91].mxu0 }
 0x1da   : > { %5891 = vmatprep.mubr.msk.bf16.mxu1 %vm1309_vm1, %v1292_v25 }
 0x1dd   : > { %v1167_v27 = vpop.f32.mrb[92].mxu0 }
 0x1de   : > { %v1169_v28 = vpop.f32.mrb[93].mxu0 }
 0x1df   : > { %v1170_v29 = vpop.f32.mrb[94].mxu0 }
 0x1e0   : > { %v1293_v30 = vpack.c.bf16 %v1170_v29, %v1167_v27  ;;  %v1172_v31 = vpop.f32.mrb[95].mxu0 }
 0x1e1   : > { %v7161_v31 = vld [vmem:[%s7768_s4] sm:$0xff]  }
 0x1e2   : > { %5892 = vmatmul.mubr.msk.bf16.gmra.mrb[4].mxu1 %vm1309_vm1, %v1293_v30  ;;  %5933 = vmatprep.mubr.msk.bf16.mxu0 %vm2380_vm2, %v7161_v31 }
 0x1e5   : > { %v1175_v32 = vpop.f32.mrb[96].mxu0 }
 0x1e6   : > { %v1177_v33 = vpop.f32.mrb[97].mxu0 }
 0x1e7   : > { %v1178_v34 = vpop.f32.mrb[98].mxu0  ;;  %v5328_v33 = vld [vmem:[%s7767_s3] ss:$0 sm:$0xff] }
 0x1e8   : > { %v1294_v35 = vpack.c.bf16 %v1178_v34, %v1175_v32  ;;  %v1180_v36 = vpop.f32.mrb[99].mxu0  ;;  %v7168_v32 = vld [vmem:[%s7768_s4 + $0x40] sm:$0xff]  }
 0x1ea   : > { %5897 = vmatprep.mubr.msk.bf16.mxu1 %vm1309_vm1, %v1294_v35 }
 0x1ed   : > { %v1183_v37 = vpop.f32.mrb[100].mxu0 }
 0x1ee   : > { %v1185_v38 = vpop.f32.mrb[101].mxu0 }
 0x1ef   : > { %v1186_v39 = vpop.f32.mrb[102].mxu0 }
 0x1f0   : > { %v1295_v40 = vpack.c.bf16 %v1186_v39, %v1183_v37  ;;  %v1188_v41 = vpop.f32.mrb[103].mxu0 }
 0x1f2   : > { %5898 = vmatmul.mubr.msk.bf16.vlgmr.msra.gmra.mrb[0].mxu1 %vm1309_vm1, %v1295_v40 }
 0x1f3   : > { %5906 = vmatpush3.bf16.msra.mxu1 %v1936_v42 }
 0x1f4   : > { %6515 = vmatprep.subr.msk.bf16.mxu1 %vm1322_vm0, %v5323_v43 }
 0x1f5   : > { %v1191_v44 = vpop.f32.mrb[104].mxu0 }
 0x1f6   : > { %v1193_v45 = vpop.f32.mrb[105].mxu0 }
 0x1f7   : > { %v1194_v46 = vpop.f32.mrb[106].mxu0 }
 0x1f8   : > { %v1296_v47 = vpack.c.bf16 %v1194_v46, %v1191_v44  ;;  %v1196_v48 = vpop.f32.mrb[107].mxu0 }
 0x1fa   : > { %5901 = vmatprep.mubr.msk.bf16.mxu1 %vm1309_vm1, %v1296_v47 }
 0x1fd   : > { %v1199_v49 = vpop.f32.mrb[108].mxu0 }
 0x1fe   : > { %v1201_v50 = vpop.f32.mrb[109].mxu0 }
 0x1ff   : > { %v1202_v51 = vpop.f32.mrb[110].mxu0 }
 0x200   : > { %v1297_v52 = vpack.c.bf16 %v1202_v51, %v1199_v49  ;;  %v1204_v53 = vpop.f32.mrb[111].mxu0 }
 0x202   : > { %5902 = vmatmul.mubr.msk.bf16.gmra.mrb[4].mxu1 %vm1309_vm1, %v1297_v52 }
 0x205   : > { %v1207_v54 = vpop.f32.mrb[112].mxu0 }
 0x206   : > { %v1209_v55 = vpop.f32.mrb[113].mxu0 }
 0x207   : > { %v1210_v56 = vpop.f32.mrb[114].mxu0 }
 0x208   : > { %v1298_v57 = vpack.c.bf16 %v1210_v56, %v1207_v54  ;;  %v1212_v59 = vpop.f32.mrb[115].mxu0 }
 0x20a   : > { %5907 = vmatprep.mubr.msk.bf16.mxu1 %vm1309_vm1, %v1298_v57 }
 0x20d   : > { %v1215_v58 = vpop.f32.mrb[116].mxu0 }
 0x20e   : > { %v1217_v60 = vpop.f32.mrb[117].mxu0 }
 0x20f   : > { %v1218_v61 = vpop.f32.mrb[118].mxu0 }
 0x210   : > { %v1299_v62 = vpack.c.bf16 %v1218_v61, %v1215_v58  ;;  %v1220_v63 = vpop.f32.mrb[119].mxu0 }
 0x211   : > { %v7183_v63 = vld [vmem:[%s7768_s4 + $0x48] sm:$0xff]  }
 0x212   : > { %5908 = vmatmul.mubr.msk.bf16.vlgmr.msra.gmra.mrb[0].mxu1 %vm1309_vm1, %v1299_v62  ;;  %v7178_v62 = vld [vmem:[%s7768_s4 + $0x8] sm:$0xff]  }
 0x213   : > { %5916 = vmatpush3.bf16.msra.mxu1 %v2026_v0  ;;  %v7188_v0 = vld [vmem:[%s7768_s4 + $0x10] sm:$0xff]  }
 0x215   : > { %v1223_v1 = vpop.f32.mrb[120].mxu0 }
 0x216   : > { %v1225_v2 = vpop.f32.mrb[121].mxu0 }
 0x217   : > { %v1226_v3 = vpop.f32.mrb[122].mxu0  ;;  %v7206_v2 = vld [vmem:[%s7768_s4 + $0x18] sm:$0xff]  }
 0x218   : > { %v1300_v4 = vpack.c.bf16 %v1226_v3, %v1223_v1  ;;  %v1228_v5 = vpop.f32.mrb[123].mxu0  ;;  %v7193_v1 = vld [vmem:[%s7768_s4 + $0x50] sm:$0xff]   ;;  %v7211_v3 = vld [vmem:[%s7768_s4 + $0x58] sm:$0xff]  }
 0x219   : > { %v7221_v5 = vld [vmem:[%s7768_s4 + $0x60] sm:$0xff]  }
 0x21a   : > { %5911 = vmatprep.mubr.msk.bf16.mxu1 %vm1309_vm1, %v1300_v4  ;;  %v7216_v4 = vld [vmem:[%s7768_s4 + $0x20] sm:$0xff]  }
 0x21d   : > { %v1231_v6 = vpop.f32.mrb[124].mxu0 }
 0x21e   : > { %v1233_v7 = vpop.f32.mrb[125].mxu0 }
 0x21f   : > { %v1234_v8 = vpop.f32.mrb[126].mxu0  ;;  %v7239_v7 = vld [vmem:[%s7768_s4 + $0x68] sm:$0xff]  }
 0x220   : > { %v1301_v9 = vpack.c.bf16 %v1234_v8, %v1231_v6  ;;  %v1236_v10 = vpop.f32.mrb[127].mxu0  ;;  %v7234_v6 = vld [vmem:[%s7768_s4 + $0x28] sm:$0xff]   ;;  %v7244_v8 = vld [vmem:[%s7768_s4 + $0x30] sm:$0xff]  }
 0x221   : > { %v7262_v10 = vld [vmem:[%s7768_s4 + $0x38] sm:$0xff]  }
 0x222   : > { %5912 = vmatmul.mubr.msk.bf16.gmra.mrb[4].mxu1 %vm1309_vm1, %v1301_v9  ;;  %v7249_v9 = vld [vmem:[%s7768_s4 + $0x70] sm:$0xff]  }
 0x225   : > { %v1239_v12 = vpop.f32.mrb[128].mxu0 }
 0x226   : > { %v1241_v13 = vpop.f32.mrb[129].mxu0 }
 0x227   : > { %v1242_v11 = vpop.f32.mrb[130].mxu0  ;;  %v7272_v13 = vld [vmem:[%s7768_s4 + $0x80] sm:$0xff]  }
 0x228   : > { %v1302_v14 = vpack.c.bf16 %v1242_v11, %v1239_v12  ;;  %v1244_v15 = vpop.f32.mrb[131].mxu0  ;;  %v7267_v12 = vld [vmem:[%s7768_s4 + $0x78] sm:$0xff]   ;;  %v7285_v11 = vld [vmem:[%s7768_s4 + $0x88] sm:$0xff]  }
 0x229   : > { %v7299_v15 = vld [vmem:[%s7768_s4 + $0x98] sm:$0xff]  }
 0x22a   : > { %5917 = vmatprep.mubr.msk.bf16.mxu1 %vm1309_vm1, %v1302_v14  ;;  %v7290_v14 = vld [vmem:[%s7768_s4 + $0x90] sm:$0xff]  }
 0x22d   : > { %v1247_v16 = vpop.f32.mrb[132].mxu0 }
 0x22e   : > { %v1249_v17 = vpop.f32.mrb[133].mxu0 }
 0x22f   : > { %v1250_v18 = vpop.f32.mrb[134].mxu0  ;;  %v7313_v17 = vld [vmem:[%s7768_s4 + $0xa8] sm:$0xff]  }
 0x230   : > { %v1303_v19 = vpack.c.bf16 %v1250_v18, %v1247_v16  ;;  %v1252_v20 = vpop.f32.mrb[135].mxu0  ;;  %v7304_v16 = vld [vmem:[%s7768_s4 + $0xa0] sm:$0xff]   ;;  %v7318_v18 = vld [vmem:[%s7768_s4 + $0xb0] sm:$0xff]  }
 0x231   : > { %v7332_v20 = vld [vmem:[%s7768_s4 + $0xc0] sm:$0xff]  }
 0x232   : > { %5918 = vmatmul.mubr.msk.bf16.vlgmr.msra.gmra.mrb[0].mxu1 %vm1309_vm1, %v1303_v19  ;;  %v7327_v19 = vld [vmem:[%s7768_s4 + $0xb8] sm:$0xff]  }
 0x235   : > { %v1255_v21 = vpop.f32.mrb[136].mxu0 }
 0x236   : > { %v1257_v22 = vpop.f32.mrb[137].mxu0 }
 0x237   : > { %v1258_v23 = vpop.f32.mrb[138].mxu0  ;;  %v7346_v22 = vld [vmem:[%s7768_s4 + $0xd0] sm:$0xff]  }
 0x238   : > { %v1304_v24 = vpack.c.bf16 %v1258_v23, %v1255_v21  ;;  %v1260_v25 = vpop.f32.mrb[139].mxu0  ;;  %v7341_v21 = vld [vmem:[%s7768_s4 + $0xc8] sm:$0xff]   ;;  %v7355_v23 = vld [vmem:[%s7768_s4 + $0xd8] sm:$0xff]  }
 0x239   : > { %v7369_v25 = vld [vmem:[%s7768_s4 + $0xe8] sm:$0xff]  }
 0x23a   : > { %5921 = vmatprep.mubr.msk.bf16.mxu1 %vm1309_vm1, %v1304_v24  ;;  %v7360_v24 = vld [vmem:[%s7768_s4 + $0xe0] sm:$0xff]  }
 0x23d   : > { %v1263_v26 = vpop.f32.mrb[140].mxu0 }
 0x23e   : > { %v1265_v27 = vpop.f32.mrb[141].mxu0 }
 0x23f   : > { %v1266_v28 = vpop.f32.mrb[142].mxu0  ;;  %v7383_v27 = vld [vmem:[%s7768_s4 + $0xf8] sm:$0xff]  }
 0x240   : > { %v1305_v29 = vpack.c.bf16 %v1266_v28, %v1263_v26  ;;  %v1268_v30 = vpop.f32.mrb[143].mxu0  ;;  %v7374_v26 = vld [vmem:[%s7768_s4 + $0xf0] sm:$0xff]   ;;  %v7388_v28 = vld [vmem:[%s7768_s4 + $0x100] sm:$0xff]  }
 0x241   : > { %v7402_v30 = vld [vmem:[%s7768_s4 + $0x110] sm:$0xff]  }
 0x242   : > { %5922 = vmatmul.mubr.msk.bf16.gmra.mrb[4].mxu1 %vm1309_vm1, %v1305_v29  ;;  %v7397_v29 = vld [vmem:[%s7768_s4 + $0x108] sm:$0xff]   ;;  %7778 = vst [vmem:[#allocation2_spill] sm:$0xff] %v7402_v30 }
 0x243   : > { %5949 = vmatprep.mubr.msk.bf16.mxu1 %vm2380_vm2, %v7168_v32 }
 0x305   : > { %v5919_v34 = vpop.f32.mrb[0].mxu1 }
 0x306   : > { %v2109_v35 = vadd.f32 %v5919_v34, %v5328_v33  ;;  %v2062_v36 = vpop.f32.mrb[1].mxu1  ;;  %v6686_v34 = vld [vmem:[%s7769_s5] sm:$0xff]  }
 0x307   : > { %v2107_v37 = vadd.f32 %v5328_v33, %v2062_v36  ;;  %v5920_v38 = vpop.f32.mrb[2].mxu1 }
 0x308   : > { %v2110_v39 = vadd.f32 %v5920_v38, %v5328_v33  ;;  %v2065_v40 = vpop.f32.mrb[3].mxu1  ;;  %v2117_v42 = vmax.f32 %v2109_v35, 0.0 }
 0x309   : > { %v2108_v41 = vadd.f32 %v5328_v33, %v2065_v40  ;;  %v2115_v44 = vmax.f32 %v2107_v37, 0.0 }
 0x30a   : > { %v2118_v43 = vmax.f32 %v2110_v39, 0.0 }
 0x30b   : > { %v2116_v45 = vmax.f32 %v2108_v41, 0.0 }
 0x30c   : > { %v2124_v46 = vpack.c.bf16 %v2118_v43, %v2117_v42 }
 0x30d   : > { %v2123_v47 = vpack.c.bf16 %v2116_v45, %v2115_v44 }
 0x30f   : > { %5925 = vmatprep.subr.bf16.mxu0 %v2123_v47  ;;  %6307 = vmatprep.subr.bf16.mxu1 %v2123_v47 }
 0x310   : > { %5926 = vmatpush3.bf16.msra.mxu0 %v2123_v47  ;;  %6311 = vmatpush3.bf16.msra.mxu1 %v2123_v47 }
 0x311   : > { %5927 = vmatprep.subr.bf16.mxu0 %v2124_v46  ;;  %6308 = vmatprep.subr.bf16.mxu1 %v2124_v46 }
 0x314   : > { %5928 = vmatpush3.bf16.msra.mxu0 %v2124_v46  ;;  %6312 = vmatpush3.bf16.msra.mxu1 %v2124_v46 }
 0x315   : > { %v5923_v48 = vpop.f32.mrb[4].mxu1 }
 0x316   : > { %v2113_v49 = vadd.f32 %v5923_v48, %v5328_v33  ;;  %v2078_v50 = vpop.f32.mrb[5].mxu1 }
 0x317   : > { %v2111_v51 = vadd.f32 %v5328_v33, %v2078_v50  ;;  %v5924_v52 = vpop.f32.mrb[6].mxu1 }
 0x318   : > { %v2114_v53 = vadd.f32 %v5924_v52, %v5328_v33  ;;  %v2081_v54 = vpop.f32.mrb[7].mxu1  ;;  %v2121_v56 = vmax.f32 %v2113_v49, 0.0 }
 0x319   : > { %v2112_v55 = vadd.f32 %v5328_v33, %v2081_v54  ;;  %v2119_v59 = vmax.f32 %v2111_v51, 0.0  ;;  %v6685_v33 = vld [vmem:[%s7769_s5 + $0x8] sm:$0xff]  }
 0x31a   : > { %v2122_v57 = vmax.f32 %v2114_v53, 0.0 }
 0x31b   : > { %v2120_v58 = vmax.f32 %v2112_v55, 0.0 }
 0x31c   : > { %v2126_v60 = vpack.c.bf16 %v2122_v57, %v2121_v56 }
 0x31d   : > { %v2125_v61 = vpack.c.bf16 %v2120_v58, %v2119_v59 }
 0x31f   : > { %5929 = vmatprep.subr.bf16.mxu0 %v2125_v61  ;;  %6309 = vmatprep.subr.bf16.mxu1 %v2125_v61 }
 0x320   : > { %5930 = vmatpush3.bf16.msra.mxu0 %v2125_v61  ;;  %6313 = vmatpush3.bf16.msra.mxu1 %v2125_v61 }
 0x321   : > { %5931 = vmatprep.subr.bf16.mxu0 %v2126_v60  ;;  %6310 = vmatprep.subr.bf16.mxu1 %v2126_v60 }
 0x324   : > { %5932 = vmatpush3.bf16.msra.mxu0 %v2126_v60  ;;  %6314 = vmatpush3.bf16.msra.mxu1 %v2126_v60 }
 0x325   : > { %6005 = vmatprep.subr.bf16.mxu1 %v6685_v33 }
 0x327   : > { %5934 = vmatmul.mubr.msk.bf16.vlgmr.msra.gmra.mrb[144].mxu0 %vm2380_vm2, %v7178_v62  ;;  %5950 = vmatmul.mubr.msk.bf16.vlgmr.msra.gmra.mrb[8].mxu1 %vm2380_vm2, %v7183_v63 }
 0x328   : > { %5937 = vmatprep.mubr.msk.bf16.mxu0 %vm2380_vm2, %v7188_v0  ;;  %5953 = vmatprep.mubr.msk.bf16.mxu1 %vm2380_vm2, %v7193_v1 }
 0x329   : > { %6006 = vmatpush3.bf16.msra.mxu1 %v6685_v33 }
 0x32a   : > { %6015 = vmatprep.subr.bf16.mxu1 %v6686_v34 }
 0x32f   : > { %5938 = vmatmul.mubr.msk.bf16.gmra.mrb[148].mxu0 %vm2380_vm2, %v7206_v2  ;;  %5954 = vmatmul.mubr.msk.bf16.gmra.mrb[12].mxu1 %vm2380_vm2, %v7211_v3 }
 0x330   : > { %5941 = vmatprep.mubr.msk.bf16.mxu0 %vm2380_vm2, %v7216_v4  ;;  %5957 = vmatprep.mubr.msk.bf16.mxu1 %vm2380_vm2, %v7221_v5 }
 0x337   : > { %5942 = vmatmul.mubr.msk.bf16.gmra.mrb[152].mxu0 %vm2380_vm2, %v7234_v6  ;;  %5958 = vmatmul.mubr.msk.bf16.gmra.mrb[16].mxu1 %vm2380_vm2, %v7239_v7 }
 0x338   : > { %5945 = vmatprep.mubr.msk.bf16.mxu0 %vm2380_vm2, %v7244_v8  ;;  %5961 = vmatprep.mubr.msk.bf16.mxu1 %vm2380_vm2, %v7249_v9 }
 0x33f   : > { %5946 = vmatmul.mubr.msk.bf16.gmra.mrb[156].mxu0 %vm2380_vm2, %v7262_v10  ;;  %5962 = vmatmul.mubr.msk.bf16.gmra.mrb[20].mxu1 %vm2380_vm2, %v7267_v12 }
 0x340   : > { %5965 = vmatprep.mubr.msk.bf16.mxu1 %vm2380_vm2, %v7272_v13  ;;  %6103 = vmatprep.mubr.msk.bf16.mxu0 %vm2380_vm2, %v7161_v31  ;;  %v7411_v31 = vld [vmem:[%s7768_s4 + $0x118] sm:$0xff]  }
 0x341   : > { %7779 = vst [vmem:[#allocation3_spill] sm:$0xff] %v7411_v31 }
 0x347   : > { %5966 = vmatmul.mubr.msk.bf16.gmra.mrb[24].mxu1 %vm2380_vm2, %v7285_v11 }
 0x348   : > { %5969 = vmatprep.mubr.msk.bf16.mxu1 %vm2380_vm2, %v7290_v14 }
 0x34f   : > { %5970 = vmatmul.mubr.msk.bf16.gmra.mrb[28].mxu1 %vm2380_vm2, %v7299_v15 }
 0x350   : > { %5973 = vmatprep.mubr.msk.bf16.mxu1 %vm2380_vm2, %v7304_v16 }
 0x357   : > { %5974 = vmatmul.mubr.msk.bf16.gmra.mrb[32].mxu1 %vm2380_vm2, %v7313_v17 }
 0x358   : > { %5977 = vmatprep.mubr.msk.bf16.mxu1 %vm2380_vm2, %v7318_v18 }
 0x35f   : > { %5978 = vmatmul.mubr.msk.bf16.gmra.mrb[36].mxu1 %vm2380_vm2, %v7327_v19 }
 0x360   : > { %5981 = vmatprep.mubr.msk.bf16.mxu1 %vm2380_vm2, %v7332_v20 }
 0x367   : > { %5982 = vmatmul.mubr.msk.bf16.gmra.mrb[40].mxu1 %vm2380_vm2, %v7341_v21 }
 0x368   : > { %5985 = vmatprep.mubr.msk.bf16.mxu1 %vm2380_vm2, %v7346_v22 }
 0x36f   : > { %5986 = vmatmul.mubr.msk.bf16.gmra.mrb[44].mxu1 %vm2380_vm2, %v7355_v23 }
 0x370   : > { %5989 = vmatprep.mubr.msk.bf16.mxu1 %vm2380_vm2, %v7360_v24 }
 0x377   : > { %5990 = vmatmul.mubr.msk.bf16.gmra.mrb[48].mxu1 %vm2380_vm2, %v7369_v25 }
 0x378   : > { %5993 = vmatprep.mubr.msk.bf16.mxu1 %vm2380_vm2, %v7374_v26 }
 0x37f   : > { %5994 = vmatmul.mubr.msk.bf16.gmra.mrb[52].mxu1 %vm2380_vm2, %v7383_v27 }
 0x380   : > { %5997 = vmatprep.mubr.msk.bf16.mxu1 %vm2380_vm2, %v7388_v28 }
 0x387   : > { %5998 = vmatmul.mubr.msk.bf16.gmra.mrb[56].mxu1 %vm2380_vm2, %v7397_v29 }
 0x388   : > { %6001 = vmatprep.mubr.msk.bf16.mxu1 %vm2380_vm2, %v7402_v30 }
 0x38f   : > { %6002 = vmatmul.mubr.msk.bf16.gmra.mrb[60].mxu1 %vm2380_vm2, %v7411_v31 }
 0x3fa   : > { %v7421_v35 = vpop.f32.mrb[144].mxu0  ;;  %v7423_v36 = vpop.f32.mrb[8].mxu1 }
 0x3fb   : > { %v2523_v37 = vpop.f32.mrb[145].mxu0  ;;  %v7425_v38 = vpop.f32.mrb[9].mxu1 }
 0x3fc   : > { %v5936_v39 = vpop.f32.mrb[146].mxu0  ;;  %v7427_v40 = vpop.f32.mrb[10].mxu1 }
 0x3fd   : > { %v2811_v41 = vpack.c.bf16 %v5936_v39, %v7421_v35  ;;  %v2526_v42 = vpop.f32.mrb[147].mxu0  ;;  %v7432_v44 = vpop.f32.mrb[11].mxu1 }
 0x3fe   : > { %v2810_v45 = vpack.c.bf16 %v2526_v42, %v2523_v37 }
 0x402   : > { %v7436_v47 = vpop.f32.mrb[148].mxu0  ;;  %v7438_v48 = vpop.f32.mrb[12].mxu1 }
 0x403   : > { %v2539_v49 = vpop.f32.mrb[149].mxu0  ;;  %v7440_v50 = vpop.f32.mrb[13].mxu1 }
 0x404   : > { %v5940_v51 = vpop.f32.mrb[150].mxu0  ;;  %v7442_v52 = vpop.f32.mrb[14].mxu1 }
 0x405   : > { %v2813_v53 = vpack.c.bf16 %v5940_v51, %v7436_v47  ;;  %v2542_v54 = vpop.f32.mrb[151].mxu0  ;;  %v7447_v56 = vpop.f32.mrb[15].mxu1 }
 0x406   : > { %v2812_v57 = vpack.c.bf16 %v2542_v54, %v2539_v49  ;;  %v2820_v59 = vpack.c.bf16 %v7447_v56, %v7440_v50  ;;  %v6687_v50 = vld [vmem:[%s7769_s5 + $0x10] sm:$0xff]  }
 0x40a   : > { %v5943_v58 = vpop.f32.mrb[152].mxu0  ;;  %v7451_v60 = vpop.f32.mrb[16].mxu1 }
 0x40b   : > { %v2555_v61 = vpop.f32.mrb[153].mxu0  ;;  %v7453_v33 = vpop.f32.mrb[17].mxu1 }
 0x40c   : > { %v5944_v35 = vpop.f32.mrb[154].mxu0  ;;  %v7455_v37 = vpop.f32.mrb[18].mxu1 }
 0x40d   : > { %v2815_v39 = vpack.c.bf16 %v5944_v35, %v5943_v58  ;;  %v2558_v42 = vpop.f32.mrb[155].mxu0  ;;  %v2622_v51 = vpop.f32.mrb[19].mxu1 }
 0x40e   : > { %v2814_v49 = vpack.c.bf16 %v2558_v42, %v2555_v61  ;;  %v2822_v54 = vpack.c.bf16 %v2622_v51, %v7453_v33 }
 0x410   : > { %6007 = vmatprep.mubr.msk.bf16.mxu1 %vm2857_vm3, %v2814_v49 }
 0x411   : > { %6008 = vmatmul.mubr.msk.bf16.vlgmr.msra.gmra.mrb[64].mxu1 %vm2857_vm3, %v2815_v39 }
 0x412   : > { %v5947_v56 = vpop.f32.mrb[156].mxu0  ;;  %6016 = vmatpush3.bf16.msra.mxu1 %v6686_v34  ;;  %v7465_v58 = vpop.f32.mrb[20].mxu1 }
 0x413   : > { %v2571_v35 = vpop.f32.mrb[157].mxu0  ;;  %6025 = vmatprep.subr.bf16.mxu1 %v6687_v50  ;;  %v2635_v55 = vpop.f32.mrb[21].mxu1 }
 0x414   : > { %v5948_v47 = vpop.f32.mrb[158].mxu0  ;;  %v7467_v43 = vpop.f32.mrb[22].mxu1 }
 0x415   : > { %v2817_v61 = vpack.c.bf16 %v5948_v47, %v5947_v56  ;;  %v2574_v33 = vpop.f32.mrb[159].mxu0  ;;  %v2825_v42 = vpack.c.bf16 %v7467_v43, %v7465_v58  ;;  %v2638_v51 = vpop.f32.mrb[23].mxu1  ;;  %v6688_v43 = vld [vmem:[%s7769_s5 + $0x18] sm:$0xff]  }
 0x416   : > { %v2816_v46 = vpack.c.bf16 %v2574_v33, %v2571_v35  ;;  %v2824_v49 = vpack.c.bf16 %v2638_v51, %v2635_v55 }
 0x418   : > { %6011 = vmatprep.mubr.msk.bf16.mxu1 %vm2857_vm3, %v2816_v46 }
 0x419   : > { %6012 = vmatmul.mubr.msk.bf16.gmra.mrb[68].mxu1 %vm2857_vm3, %v2817_v61  ;;  %v7780_v61 = vpack.c.bf16 %v7432_v44, %v7425_v38 }
 0x41a   : > { %6017 = vmatprep.mubr.msk.bf16.mxu1 %vm2857_vm3, %v2810_v45  ;;  %v7474_v34 = vpop.f32.mrb[24].mxu1 }
 0x41b   : > { %v2651_v39 = vpop.f32.mrb[25].mxu1 }
 0x41c   : > { %v7476_v31 = vpop.f32.mrb[26].mxu1 }
 0x41d   : > { %v2827_v47 = vpack.c.bf16 %v7476_v31, %v7474_v34  ;;  %v2654_v56 = vpop.f32.mrb[27].mxu1 }
 0x41e   : > { %v2826_v30 = vpack.c.bf16 %v2654_v56, %v2651_v39  ;;  %v6689_v39 = vld [vmem:[%s7769_s5 + $0x20] sm:$0xff]  }
 0x421   : > { %6018 = vmatmul.mubr.msk.bf16.vlgmr.msra.gmra.mrb[64].mxu1 %vm2857_vm3, %v2811_v41 }
 0x422   : > { %6021 = vmatprep.mubr.msk.bf16.mxu1 %vm2857_vm3, %v2812_v57  ;;  %6026 = vmatpush3.bf16.msra.mxu1 %v6687_v50  ;;  %v7485_v45 = vpop.f32.mrb[28].mxu1 }
 0x423   : > { %6035 = vmatprep.subr.bf16.mxu1 %v6688_v43  ;;  %v2667_v46 = vpop.f32.mrb[29].mxu1 }
 0x424   : > { %v5972_v55 = vpop.f32.mrb[30].mxu1 }
 0x425   : > { %v2829_v58 = vpack.c.bf16 %v5972_v55, %v7485_v45  ;;  %v2670_v35 = vpop.f32.mrb[31].mxu1 }
 0x426   : > { %v2828_v31 = vpack.c.bf16 %v2670_v35, %v2667_v46  ;;  %v7782_v35 = vpack.c.bf16 %v7442_v52, %v7438_v48 }
 0x429   : > { %6022 = vmatmul.mubr.msk.bf16.gmra.mrb[68].mxu1 %vm2857_vm3, %v2813_v53  ;;  %v7781_v53 = vpack.c.bf16 %v7427_v40, %v7423_v36 }
 0x42a   : > { %6027 = vmatprep.mubr.msk.bf16.mxu1 %vm2857_vm3, %v7780_v61  ;;  %v7493_v41 = vpop.f32.mrb[32].mxu1 }
 0x42b   : > { %v2683_v57 = vpop.f32.mrb[33].mxu1 }
 0x42c   : > { %v7495_v50 = vpop.f32.mrb[34].mxu1 }
 0x42d   : > { %v2831_v33 = vpack.c.bf16 %v7495_v50, %v7493_v41  ;;  %v2686_v51 = vpop.f32.mrb[35].mxu1  ;;  %v7783_v50 = vpack.c.bf16 %v7455_v37, %v7451_v60 }
 0x42e   : > { %v2830_v34 = vpack.c.bf16 %v2686_v51, %v2683_v57  ;;  %v6690_v57 = vld [vmem:[%s7769_s5 + $0x28] sm:$0xff]  }
 0x431   : > { %6028 = vmatmul.mubr.msk.bf16.vlgmr.msra.gmra.mrb[64].mxu1 %vm2857_vm3, %v7781_v53 }
 0x432   : > { %6031 = vmatprep.mubr.msk.bf16.mxu1 %vm2857_vm3, %v2820_v59  ;;  %6036 = vmatpush3.bf16.msra.mxu1 %v6688_v43  ;;  %v7507_v38 = vpop.f32.mrb[36].mxu1 }
 0x433   : > { %6045 = vmatprep.subr.bf16.mxu1 %v6689_v39  ;;  %v2699_v44 = vpop.f32.mrb[37].mxu1 }
 0x434   : > { %v5980_v56 = vpop.f32.mrb[38].mxu1 }
 0x435   : > { %v2833_v45 = vpack.c.bf16 %v5980_v56, %v7507_v38  ;;  %v2702_v46 = vpop.f32.mrb[39].mxu1 }
 0x436   : > { %v2832_v55 = vpack.c.bf16 %v2702_v46, %v2699_v44 }
 0x439   : > { %6032 = vmatmul.mubr.msk.bf16.gmra.mrb[68].mxu1 %vm2857_vm3, %v7782_v35 }
 0x43a   : > { %6037 = vmatprep.mubr.msk.bf16.mxu1 %vm2857_vm3, %v2822_v54  ;;  %v5983_v36 = vpop.f32.mrb[40].mxu1 }
 0x43b   : > { %v2715_v40 = vpop.f32.mrb[41].mxu1 }
 0x43c   : > { %v5984_v59 = vpop.f32.mrb[42].mxu1 }
 0x43d   : > { %v2835_v43 = vpack.c.bf16 %v5984_v59, %v5983_v36  ;;  %v2718_v61 = vpop.f32.mrb[43].mxu1 }
 0x43e   : > { %v2834_v41 = vpack.c.bf16 %v2718_v61, %v2715_v40 }
 0x441   : > { %6038 = vmatmul.mubr.msk.bf16.vlgmr.msra.gmra.mrb[64].mxu1 %vm2857_vm3, %v7783_v50 }
 0x442   : > { %6041 = vmatprep.mubr.msk.bf16.mxu1 %vm2857_vm3, %v2824_v49  ;;  %6046 = vmatpush3.bf16.msra.mxu1 %v6689_v39  ;;  %v5987_v48 = vpop.f32.mrb[44].mxu1  ;;  %v6691_v49 = vld [vmem:[%s7769_s5 + $0x30] sm:$0xff]  }
 0x443   : > { %6055 = vmatprep.subr.bf16.mxu1 %v6690_v57  ;;  %v2731_v52 = vpop.f32.mrb[45].mxu1 }
 0x444   : > { %v5988_v54 = vpop.f32.mrb[46].mxu1 }
 0x445   : > { %v2837_v51 = vpack.c.bf16 %v5988_v54, %v5987_v48  ;;  %v2734_v53 = vpop.f32.mrb[47].mxu1 }
 0x446   : > { %v2836_v38 = vpack.c.bf16 %v2734_v53, %v2731_v52 }
 0x449   : > { %6042 = vmatmul.mubr.msk.bf16.gmra.mrb[68].mxu1 %vm2857_vm3, %v2825_v42 }
 0x44a   : > { %6047 = vmatprep.mubr.msk.bf16.mxu1 %vm2857_vm3, %v2826_v30  ;;  %v5991_v44 = vpop.f32.mrb[48].mxu1 }
 0x44b   : > { %v2747_v56 = vpop.f32.mrb[49].mxu1 }
 0x44c   : > { %v5992_v46 = vpop.f32.mrb[50].mxu1 }
 0x44d   : > { %v2839_v60 = vpack.c.bf16 %v5992_v46, %v5991_v44  ;;  %v2750_v37 = vpop.f32.mrb[51].mxu1  ;;  %v6693_v46 = vld [vmem:[%s7769_s5 + $0x40] sm:$0xff]  }
 0x44e   : > { %v2838_v35 = vpack.c.bf16 %v2750_v37, %v2747_v56 }
 0x451   : > { %6048 = vmatmul.mubr.msk.bf16.vlgmr.msra.gmra.mrb[64].mxu1 %vm2857_vm3, %v2827_v47 }
 0x452   : > { %6051 = vmatprep.mubr.msk.bf16.mxu1 %vm2857_vm3, %v2828_v31  ;;  %6056 = vmatpush3.bf16.msra.mxu1 %v6690_v57  ;;  %v5995_v39 = vpop.f32.mrb[52].mxu1  ;;  %v6692_v31 = vld [vmem:[%s7769_s5 + $0x38] sm:$0xff]  }
 0x453   : > { %6065 = vmatprep.subr.bf16.mxu1 %v6691_v49  ;;  %v2763_v42 = vpop.f32.mrb[53].mxu1 }
 0x454   : > { %v5996_v36 = vpop.f32.mrb[54].mxu1 }
 0x455   : > { %v2841_v30 = vpack.c.bf16 %v5996_v36, %v5995_v39  ;;  %v2766_v40 = vpop.f32.mrb[55].mxu1 }
 0x456   : > { %v2840_v59 = vpack.c.bf16 %v2766_v40, %v2763_v42 }
 0x459   : > { %6052 = vmatmul.mubr.msk.bf16.gmra.mrb[68].mxu1 %vm2857_vm3, %v2829_v58 }
 0x45a   : > { %6057 = vmatprep.mubr.msk.bf16.mxu1 %vm2857_vm3, %v2830_v34  ;;  %v5999_v61 = vpop.f32.mrb[56].mxu1 }
 0x45b   : > { %v2779_v50 = vpop.f32.mrb[57].mxu1 }
 0x45c   : > { %v6000_v48 = vpop.f32.mrb[58].mxu1 }
 0x45d   : > { %v2843_v52 = vpack.c.bf16 %v6000_v48, %v5999_v61  ;;  %v2782_v54 = vpop.f32.mrb[59].mxu1 }
 0x45e   : > { %v2842_v47 = vpack.c.bf16 %v2782_v54, %v2779_v50 }
 0x461   : > { %6058 = vmatmul.mubr.msk.bf16.vlgmr.msra.gmra.mrb[64].mxu1 %vm2857_vm3, %v2831_v33  ;;  %v5462_v33 = vld [vmem:[%s7770_s6] ss:$0 sm:$0xff] }
 0x462   : > { %6061 = vmatprep.mubr.msk.bf16.mxu1 %vm2857_vm3, %v2832_v55  ;;  %6066 = vmatpush3.bf16.msra.mxu1 %v6691_v49  ;;  %v6003_v57 = vpop.f32.mrb[60].mxu1 }
 0x463   : > { %6075 = vmatprep.subr.bf16.mxu1 %v6692_v31  ;;  %v2795_v58 = vpop.f32.mrb[61].mxu1 }
 0x464   : > { %v6004_v53 = vpop.f32.mrb[62].mxu1 }
 0x465   : > { %v2845_v34 = vpack.c.bf16 %v6004_v53, %v6003_v57  ;;  %v2798_v44 = vpop.f32.mrb[63].mxu1 }
 0x466   : > { %v2844_v56 = vpack.c.bf16 %v2798_v44, %v2795_v58 }
 0x469   : > { %6062 = vmatmul.mubr.msk.bf16.gmra.mrb[68].mxu1 %vm2857_vm3, %v2833_v45 }
 0x46a   : > { %6067 = vmatprep.mubr.msk.bf16.mxu1 %vm2857_vm3, %v2834_v41 }
 0x471   : > { %6068 = vmatmul.mubr.msk.bf16.vlgmr.msra.gmra.mrb[64].mxu1 %vm2857_vm3, %v2835_v43 }
 0x472   : > { %6071 = vmatprep.mubr.msk.bf16.mxu1 %vm2857_vm3, %v2836_v38  ;;  %6076 = vmatpush3.bf16.msra.mxu1 %v6692_v31 }
 0x473   : > { %6085 = vmatprep.subr.bf16.mxu1 %v6693_v46 }
 0x479   : > { %6072 = vmatmul.mubr.msk.bf16.gmra.mrb[68].mxu1 %vm2857_vm3, %v2837_v51 }
 0x47a   : > { %6077 = vmatprep.mubr.msk.bf16.mxu1 %vm2857_vm3, %v2838_v35 }
 0x481   : > { %6078 = vmatmul.mubr.msk.bf16.vlgmr.msra.gmra.mrb[64].mxu1 %vm2857_vm3, %v2839_v60 }
 0x482   : > { %6081 = vmatprep.mubr.msk.bf16.mxu1 %vm2857_vm3, %v2840_v59  ;;  %6086 = vmatpush3.bf16.msra.mxu1 %v6693_v46 }
 0x489   : > { %6082 = vmatmul.mubr.msk.bf16.gmra.mrb[68].mxu1 %vm2857_vm3, %v2841_v30 }
 0x48a   : > { %6087 = vmatprep.mubr.msk.bf16.mxu1 %vm2857_vm3, %v2842_v47 }
 0x491   : > { %6088 = vmatmul.mubr.msk.bf16.vlgmr.msra.gmra.mrb[64].mxu1 %vm2857_vm3, %v2843_v52 }
 0x492   : > { %6091 = vmatprep.mubr.msk.bf16.mxu1 %vm2857_vm3, %v2844_v56 }
 0x499   : > { %6092 = vmatmul.mubr.msk.bf16.gmra.mrb[68].mxu1 %vm2857_vm3, %v2845_v34 }
 0x564   : > { %v6089_v45 = vpop.f32.mrb[64].mxu1 }
 0x565   : > { %v3684_v55 = vadd.f32 %v6089_v45, %v5462_v33  ;;  %v3637_v43 = vpop.f32.mrb[65].mxu1 }
 0x566   : > { %v3682_v41 = vadd.f32 %v5462_v33, %v3637_v43  ;;  %v6090_v51 = vpop.f32.mrb[66].mxu1  ;;  %v6714_v43 = vld [vmem:[%s7773_s9 + $0x10] sm:$0xff]  }
 0x567   : > { %v3685_v38 = vadd.f32 %v6090_v51, %v5462_v33  ;;  %v3640_v60 = vpop.f32.mrb[67].mxu1  ;;  %v3692_v35 = vmax.f32 %v3684_v55, 0.0  ;;  %v6699_v51 = vld [vmem:[%s7771_s7 + $0x28] sm:$0xff]  }
 0x568   : > { %v3683_v37 = vadd.f32 %v5462_v33, %v3640_v60  ;;  %v3690_v39 = vmax.f32 %v3682_v41, 0.0 }
 0x569   : > { %v3693_v49 = vmax.f32 %v3685_v38, 0.0  ;;  %v6715_v38 = vld [vmem:[%s7773_s9 + $0x18] sm:$0xff]  }
 0x56a   : > { %v3691_v42 = vmax.f32 %v3683_v37, 0.0 }
 0x56b   : > { %v3699_v36 = vpack.c.bf16 %v3693_v49, %v3692_v35  ;;  %v6700_v35 = vld [vmem:[%s7771_s7 + $0x30] sm:$0xff]  }
 0x56c   : > { %v3698_v30 = vpack.c.bf16 %v3691_v42, %v3690_v39  ;;  %v6093_v40 = vpop.f32.mrb[68].mxu1 }
 0x56d   : > { %v3688_v59 = vadd.f32 %v6093_v40, %v5462_v33  ;;  %v3653_v61 = vpop.f32.mrb[69].mxu1  ;;  %v6717_v40 = vld [vmem:[%s7773_s9 + $0x28] sm:$0xff]  }
 0x56e   : > { %v3686_v50 = vadd.f32 %v5462_v33, %v3653_v61  ;;  %v6094_v48 = vpop.f32.mrb[70].mxu1  ;;  %6095 = vmatprep.subr.bf16.mxu0 %v3698_v30 }
 0x56f   : > { %v3689_v52 = vadd.f32 %v6094_v48, %v5462_v33  ;;  %v3656_v54 = vpop.f32.mrb[71].mxu1  ;;  %6096 = vmatpush3.bf16.msra.mxu0 %v3698_v30  ;;  %v3696_v31 = vmax.f32 %v3688_v59, 0.0 }
 0x570   : > { %v3687_v47 = vadd.f32 %v5462_v33, %v3656_v54  ;;  %6097 = vmatprep.subr.bf16.mxu0 %v3699_v36  ;;  %v3694_v58 = vmax.f32 %v3686_v50, 0.0 }
 0x571   : > { %v3697_v57 = vmax.f32 %v3689_v52, 0.0 }
 0x572   : > { %v3695_v53 = vmax.f32 %v3687_v47, 0.0  ;;  %v6701_v47 = vld [vmem:[%s7771_s7 + $0x38] sm:$0xff]  }
 0x573   : > { %v3701_v34 = vpack.c.bf16 %v3697_v57, %v3696_v31  ;;  %6098 = vmatpush3.bf16.msra.mxu0 %v3699_v36  ;;  %v6716_v36 = vld [vmem:[%s7773_s9 + $0x20] sm:$0xff]  }
 0x574   : > { %v3700_v44 = vpack.c.bf16 %v3695_v53, %v3694_v58  ;;  %v6702_v58 = vld [vmem:[%s7771_s7 + $0x40] sm:$0xff]  }
 0x576   : > { %6099 = vmatprep.subr.bf16.mxu0 %v3700_v44 }
 0x577   : > { %6100 = vmatpush3.bf16.msra.mxu0 %v3700_v44 }
 0x578   : > { %6101 = vmatprep.subr.bf16.mxu0 %v3701_v34 }
 0x57b   : > { %6102 = vmatpush3.bf16.msra.mxu0 %v3701_v34 }
 0x57e   : > { %6104 = vmatmul.mubr.msk.bf16.vlgmr.msra.gmra.mrb[160].mxu0 %vm2380_vm2, %v7178_v62  ;;  %v6695_v62 = vld [vmem:[%s7771_s7 + $0x18] sm:$0xff]  }
 0x57f   : > { %6107 = vmatprep.mubr.msk.bf16.mxu0 %vm2380_vm2, %v7188_v0  ;;  %v7784_v0 = vld [vmem:[#allocation2_spill] sm:$0xff] }
 0x586   : > { %6108 = vmatmul.mubr.msk.bf16.gmra.mrb[164].mxu0 %vm2380_vm2, %v7206_v2 }
 0x587   : > { %6111 = vmatprep.mubr.msk.bf16.mxu0 %vm2380_vm2, %v7216_v4 }
 0x58e   : > { %6112 = vmatmul.mubr.msk.bf16.gmra.mrb[168].mxu0 %vm2380_vm2, %v7234_v6 }
 0x58f   : > { %6115 = vmatprep.mubr.msk.bf16.mxu0 %vm2380_vm2, %v7244_v8 }
 0x596   : > { %6116 = vmatmul.mubr.msk.bf16.gmra.mrb[172].mxu0 %vm2380_vm2, %v7262_v10 }
 0x597   : > { %6119 = vmatprep.mubr.msk.bf16.mxu0 %vm2380_vm2, %v7168_v32  ;;  %v6694_v32 = vld [vmem:[%s7771_s7 + $0x10] sm:$0xff]  }
 0x598   : > { %6175 = vmatprep.subr.bf16.mxu1 %v6694_v32 }
 0x599   : > { %6176 = vmatpush3.bf16.msra.mxu1 %v6694_v32 }
 0x59a   : > { %6177 = vmatprep.subr.bf16.mxu1 %v6695_v62 }
 0x59d   : > { %6178 = vmatpush3.bf16.msra.mxu1 %v6695_v62 }
 0x59e   : > { %6120 = vmatmul.mubr.msk.bf16.gmra.mrb[176].mxu0 %vm2380_vm2, %v7183_v63  ;;  %v6696_v63 = vld [vmem:[%s7771_s7] sm:$0xff]  }
 0x59f   : > { %6123 = vmatprep.mubr.msk.bf16.mxu0 %vm2380_vm2, %v7193_v1  ;;  %6187 = vmatprep.subr.bf16.mxu1 %v6696_v63  ;;  %v7785_v1 = vld [vmem:[#allocation3_spill] sm:$0xff] }
 0x5a6   : > { %6124 = vmatmul.mubr.msk.bf16.gmra.mrb[180].mxu0 %vm2380_vm2, %v7211_v3 }
 0x5a7   : > { %6127 = vmatprep.mubr.msk.bf16.mxu0 %vm2380_vm2, %v7221_v5 }
 0x5ae   : > { %6128 = vmatmul.mubr.msk.bf16.gmra.mrb[184].mxu0 %vm2380_vm2, %v7239_v7 }
 0x5af   : > { %6131 = vmatprep.mubr.msk.bf16.mxu0 %vm2380_vm2, %v7249_v9 }
 0x5b6   : > { %6132 = vmatmul.mubr.msk.bf16.gmra.mrb[188].mxu0 %vm2380_vm2, %v7267_v12 }
 0x5b7   : > { %6135 = vmatprep.mubr.msk.bf16.mxu0 %vm2380_vm2, %v7272_v13 }
 0x5be   : > { %6136 = vmatmul.mubr.msk.bf16.gmra.mrb[192].mxu0 %vm2380_vm2, %v7285_v11 }
 0x5bf   : > { %6139 = vmatprep.mubr.msk.bf16.mxu0 %vm2380_vm2, %v7290_v14 }
 0x5c6   : > { %6140 = vmatmul.mubr.msk.bf16.gmra.mrb[196].mxu0 %vm2380_vm2, %v7299_v15 }
 0x5c7   : > { %6143 = vmatprep.mubr.msk.bf16.mxu0 %vm2380_vm2, %v7304_v16 }
 0x5ce   : > { %6144 = vmatmul.mubr.msk.bf16.gmra.mrb[200].mxu0 %vm2380_vm2, %v7313_v17 }
 0x5cf   : > { %6147 = vmatprep.mubr.msk.bf16.mxu0 %vm2380_vm2, %v7318_v18 }
 0x5d6   : > { %6148 = vmatmul.mubr.msk.bf16.gmra.mrb[204].mxu0 %vm2380_vm2, %v7327_v19 }
 0x5d7   : > { %6151 = vmatprep.mubr.msk.bf16.mxu0 %vm2380_vm2, %v7332_v20  ;;  %v6697_v20 = vld [vmem:[%s7771_s7 + $0x8] sm:$0xff]  }
 0x5de   : > { %6152 = vmatmul.mubr.msk.bf16.gmra.mrb[208].mxu0 %vm2380_vm2, %v7341_v21 }
 0x5df   : > { %6155 = vmatprep.mubr.msk.bf16.mxu0 %vm2380_vm2, %v7346_v22 }
 0x5e6   : > { %6156 = vmatmul.mubr.msk.bf16.gmra.mrb[212].mxu0 %vm2380_vm2, %v7355_v23  ;;  %v6698_v23 = vld [vmem:[%s7771_s7 + $0x20] sm:$0xff]  }
 0x5e7   : > { %6159 = vmatprep.mubr.msk.bf16.mxu0 %vm2380_vm2, %v7360_v24 }
 0x5ee   : > { %6160 = vmatmul.mubr.msk.bf16.gmra.mrb[216].mxu0 %vm2380_vm2, %v7369_v25 }
 0x5ef   : > { %6163 = vmatprep.mubr.msk.bf16.mxu0 %vm2380_vm2, %v7374_v26 }
 0x5f6   : > { %6164 = vmatmul.mubr.msk.bf16.gmra.mrb[220].mxu0 %vm2380_vm2, %v7383_v27 }
 0x5f7   : > { %6167 = vmatprep.mubr.msk.bf16.mxu0 %vm2380_vm2, %v7388_v28  ;;  %v6712_v28 = vld [vmem:[%s7773_s9] sm:$0xff]  }
 0x5f8   : > { %6283 = vmatprep.subr.bf16.mxu0 %v6712_v28 }
 0x5f9   : > { %6284 = vmatpush3.bf16.msra.mxu0 %v6712_v28 }
 0x5fe   : > { %6168 = vmatmul.mubr.msk.bf16.gmra.mrb[224].mxu0 %vm2380_vm2, %v7397_v29  ;;  %v6713_v29 = vld [vmem:[%s7773_s9 + $0x8] sm:$0xff]  }
 0x5ff   : > { %6171 = vmatprep.mubr.msk.bf16.mxu0 %vm2380_vm2, %v7784_v0  ;;  %6285 = vmatprep.subr.bf16.mxu0 %v6713_v29 }
 0x600   : > { %6286 = vmatpush3.bf16.msra.mxu0 %v6713_v29 }
 0x601   : > { %6287 = vmatprep.subr.bf16.mxu0 %v6714_v43 }
 0x604   : > { %6288 = vmatpush3.bf16.msra.mxu0 %v6714_v43  ;;  %v6708_v43 = vld [vmem:[%s7771_s7 + $0x70] sm:$0xff]  }
 0x605   : > { %6289 = vmatprep.subr.bf16.mxu0 %v6715_v38 }
 0x606   : > { %6172 = vmatmul.mubr.msk.bf16.gmra.mrb[228].mxu0 %vm2380_vm2, %v7785_v1 }
 0x608   : > { %6290 = vmatpush3.bf16.msra.mxu0 %v6715_v38 }
 0x609   : > { %6291 = vmatprep.subr.bf16.mxu0 %v6716_v36 }
 0x60c   : > { %6292 = vmatpush3.bf16.msra.mxu0 %v6716_v36 }
 0x60d   : > { %6293 = vmatprep.subr.bf16.mxu0 %v6717_v40 }
 0x610   : > { %6294 = vmatpush3.bf16.msra.mxu0 %v6717_v40 }
 0x651   : > { %v6105_v2 = vpop.f32.mrb[160].mxu0 }
 0x652   : > { %v3737_v3 = vpop.f32.mrb[161].mxu0 }
 0x653   : > { %v6106_v4 = vpop.f32.mrb[162].mxu0 }
 0x654   : > { %v4025_v5 = vpack.c.bf16 %v6106_v4, %v6105_v2  ;;  %v3740_v6 = vpop.f32.mrb[163].mxu0  ;;  %v6703_v4 = vld [vmem:[%s7771_s7 + $0x48] sm:$0xff]  }
 0x655   : > { %v4024_v7 = vpack.c.bf16 %v3740_v6, %v3737_v3 }
 0x659   : > { %v7635_v8 = vpop.f32.mrb[164].mxu0 }
 0x65a   : > { %v3753_v9 = vpop.f32.mrb[165].mxu0 }
 0x65b   : > { %v6110_v10 = vpop.f32.mrb[166].mxu0 }
 0x65c   : > { %v4027_v12 = vpack.c.bf16 %v6110_v10, %v7635_v8  ;;  %v3756_v13 = vpop.f32.mrb[167].mxu0 }
 0x65d   : > { %v4026_v11 = vpack.c.bf16 %v3756_v13, %v3753_v9 }
 0x661   : > { %v6113_v14 = vpop.f32.mrb[168].mxu0 }
 0x662   : > { %v3769_v15 = vpop.f32.mrb[169].mxu0 }
 0x663   : > { %v6114_v16 = vpop.f32.mrb[170].mxu0 }
 0x664   : > { %v4029_v17 = vpack.c.bf16 %v6114_v16, %v6113_v14  ;;  %v3772_v18 = vpop.f32.mrb[171].mxu0 }
 0x665   : > { %v4028_v19 = vpack.c.bf16 %v3772_v18, %v3769_v15  ;;  %v6705_v18 = vld [vmem:[%s7771_s7 + $0x58] sm:$0xff]  }
 0x667   : > { %6179 = vmatprep.mubr.msk.bf16.mxu1 %vm4081_vm4, %v4028_v19 }
 0x668   : > { %6180 = vmatmul.mubr.msk.bf16.vlgmr.msra.gmra.mrb[72].mxu1 %vm4081_vm4, %v4029_v17 }
 0x669   : > { %v6117_v21 = vpop.f32.mrb[172].mxu0  ;;  %6188 = vmatpush3.bf16.msra.mxu1 %v6696_v63 }
 0x66a   : > { %v3785_v22 = vpop.f32.mrb[173].mxu0  ;;  %6189 = vmatprep.subr.bf16.mxu1 %v6697_v20 }
 0x66b   : > { %v6118_v24 = vpop.f32.mrb[174].mxu0 }
 0x66c   : > { %v4031_v25 = vpack.c.bf16 %v6118_v24, %v6117_v21  ;;  %v3788_v26 = vpop.f32.mrb[175].mxu0  ;;  %v6706_v21 = vld [vmem:[%s7771_s7 + $0x60] sm:$0xff]  }
 0x66d   : > { %v4030_v27 = vpack.c.bf16 %v3788_v26, %v3785_v22  ;;  %6190 = vmatpush3.bf16.msra.mxu1 %v6697_v20 }
 0x66e   : > { %6199 = vmatprep.subr.bf16.mxu1 %v6698_v23 }
 0x66f   : > { %6183 = vmatprep.mubr.msk.bf16.mxu1 %vm4081_vm4, %v4030_v27 }
 0x670   : > { %6184 = vmatmul.mubr.msk.bf16.gmra.mrb[76].mxu1 %vm4081_vm4, %v4031_v25 }
 0x671   : > { %6191 = vmatprep.mubr.msk.bf16.mxu1 %vm4081_vm4, %v4024_v7  ;;  %v6121_v56 = vpop.f32.mrb[176].mxu0  ;;  %v6704_v7 = vld [vmem:[%s7771_s7 + $0x50] sm:$0xff]  }
 0x672   : > { %v3801_v46 = vpop.f32.mrb[177].mxu0 }
 0x673   : > { %v6122_v33 = vpop.f32.mrb[178].mxu0 }
 0x674   : > { %v4033_v45 = vpack.c.bf16 %v6122_v33, %v6121_v56  ;;  %v3804_v55 = vpop.f32.mrb[179].mxu0  ;;  %v6707_v33 = vld [vmem:[%s7771_s7 + $0x68] sm:$0xff]  }
 0x675   : > { %v4032_v41 = vpack.c.bf16 %v3804_v55, %v3801_v46 }
 0x678   : > { %6192 = vmatmul.mubr.msk.bf16.vlgmr.msra.gmra.mrb[72].mxu1 %vm4081_vm4, %v4025_v5 }
 0x679   : > { %6195 = vmatprep.mubr.msk.bf16.mxu1 %vm4081_vm4, %v4026_v11  ;;  %6200 = vmatpush3.bf16.msra.mxu1 %v6698_v23  ;;  %v6125_v60 = vpop.f32.mrb[180].mxu0 }
 0x67a   : > { %6201 = vmatprep.subr.bf16.mxu1 %v6699_v51  ;;  %v3817_v37 = vpop.f32.mrb[181].mxu0 }
 0x67b   : > { %v6126_v49 = vpop.f32.mrb[182].mxu0 }
 0x67c   : > { %v4035_v39 = vpack.c.bf16 %v6126_v49, %v6125_v60  ;;  %v3820_v42 = vpop.f32.mrb[183].mxu0 }
 0x67d   : > { %6202 = vmatpush3.bf16.msra.mxu1 %v6699_v51  ;;  %v4034_v30 = vpack.c.bf16 %v3820_v42, %v3817_v37 }
 0x67e   : > { %6211 = vmatprep.subr.bf16.mxu1 %v6700_v35 }
 0x680   : > { %6196 = vmatmul.mubr.msk.bf16.gmra.mrb[76].mxu1 %vm4081_vm4, %v4027_v12 }
 0x681   : > { %6203 = vmatprep.mubr.msk.bf16.mxu1 %vm4081_vm4, %v4032_v41  ;;  %v6129_v59 = vpop.f32.mrb[184].mxu0 }
 0x682   : > { %v3833_v61 = vpop.f32.mrb[185].mxu0 }
 0x683   : > { %v6130_v50 = vpop.f32.mrb[186].mxu0 }
 0x684   : > { %v4037_v48 = vpack.c.bf16 %v6130_v50, %v6129_v59  ;;  %v3836_v52 = vpop.f32.mrb[187].mxu0 }
 0x685   : > { %v4036_v54 = vpack.c.bf16 %v3836_v52, %v3833_v61  ;;  %v6710_v61 = vld [vmem:[%s7771_s7 + $0x80] sm:$0xff]  }
 0x688   : > { %6204 = vmatmul.mubr.msk.bf16.vlgmr.msra.gmra.mrb[72].mxu1 %vm4081_vm4, %v4033_v45 }
 0x689   : > { %6207 = vmatprep.mubr.msk.bf16.mxu1 %vm4081_vm4, %v4034_v30  ;;  %6212 = vmatpush3.bf16.msra.mxu1 %v6700_v35  ;;  %v6133_v31 = vpop.f32.mrb[188].mxu0  ;;  %v6709_v30 = vld [vmem:[%s7771_s7 + $0x78] sm:$0xff]  }
 0x68a   : > { %6213 = vmatprep.subr.bf16.mxu1 %v6701_v47  ;;  %v3849_v57 = vpop.f32.mrb[189].mxu0 }
 0x68b   : > { %v6134_v53 = vpop.f32.mrb[190].mxu0 }
 0x68c   : > { %v4039_v34 = vpack.c.bf16 %v6134_v53, %v6133_v31  ;;  %v3852_v44 = vpop.f32.mrb[191].mxu0 }
 0x68d   : > { %6214 = vmatpush3.bf16.msra.mxu1 %v6701_v47  ;;  %v4038_v32 = vpack.c.bf16 %v3852_v44, %v3849_v57  ;;  %v6711_v44 = vld [vmem:[%s7771_s7 + $0x88] sm:$0xff]  }
 0x68e   : > { %6223 = vmatprep.subr.bf16.mxu1 %v6702_v58 }
 0x690   : > { %6208 = vmatmul.mubr.msk.bf16.gmra.mrb[76].mxu1 %vm4081_vm4, %v4035_v39 }
 0x691   : > { %6215 = vmatprep.mubr.msk.bf16.mxu1 %vm4081_vm4, %v4036_v54  ;;  %v6137_v62 = vpop.f32.mrb[192].mxu0 }
 0x692   : > { %v3865_v63 = vpop.f32.mrb[193].mxu0 }
 0x693   : > { %v6138_v0 = vpop.f32.mrb[194].mxu0 }
 0x694   : > { %v4041_v1 = vpack.c.bf16 %v6138_v0, %v6137_v62  ;;  %v3868_v2 = vpop.f32.mrb[195].mxu0 }
 0x695   : > { %v4040_v3 = vpack.c.bf16 %v3868_v2, %v3865_v63 }
 0x698   : > { %6216 = vmatmul.mubr.msk.bf16.vlgmr.msra.gmra.mrb[72].mxu1 %vm4081_vm4, %v4037_v48 }
 0x699   : > { %6219 = vmatprep.mubr.msk.bf16.mxu1 %vm4081_vm4, %v4038_v32  ;;  %6224 = vmatpush3.bf16.msra.mxu1 %v6702_v58  ;;  %v6141_v5 = vpop.f32.mrb[196].mxu0 }
 0x69a   : > { %6225 = vmatprep.subr.bf16.mxu1 %v6703_v4  ;;  %v3881_v6 = vpop.f32.mrb[197].mxu0 }
 0x69b   : > { %v6142_v8 = vpop.f32.mrb[198].mxu0 }
 0x69c   : > { %v4043_v9 = vpack.c.bf16 %v6142_v8, %v6141_v5  ;;  %v3884_v10 = vpop.f32.mrb[199].mxu0  ;;  %v5585_v5 = vld [vmem:[%s7772_s8] ss:$0 sm:$0xff] }
 0x69d   : > { %6226 = vmatpush3.bf16.msra.mxu1 %v6703_v4  ;;  %v4042_v12 = vpack.c.bf16 %v3884_v10, %v3881_v6  ;;  %v6719_v4 = vld [vmem:[%s7773_s9 + $0x38] sm:$0xff]  }
 0x69e   : > { %6235 = vmatprep.subr.bf16.mxu1 %v6704_v7 }
 0x6a0   : > { %6220 = vmatmul.mubr.msk.bf16.gmra.mrb[76].mxu1 %vm4081_vm4, %v4039_v34 }
 0x6a1   : > { %6227 = vmatprep.mubr.msk.bf16.mxu1 %vm4081_vm4, %v4040_v3  ;;  %v6145_v13 = vpop.f32.mrb[200].mxu0  ;;  %v6718_v3 = vld [vmem:[%s7773_s9 + $0x30] sm:$0xff]  }
 0x6a2   : > { %v3897_v11 = vpop.f32.mrb[201].mxu0  ;;  %6295 = vmatprep.subr.bf16.mxu0 %v6718_v3 }
 0x6a3   : > { %v6146_v14 = vpop.f32.mrb[202].mxu0  ;;  %6296 = vmatpush3.bf16.msra.mxu0 %v6718_v3 }
 0x6a4   : > { %v4045_v15 = vpack.c.bf16 %v6146_v14, %v6145_v13  ;;  %v3900_v16 = vpop.f32.mrb[203].mxu0  ;;  %6297 = vmatprep.subr.bf16.mxu0 %v6719_v4 }
 0x6a5   : > { %v4044_v17 = vpack.c.bf16 %v3900_v16, %v3897_v11 }
 0x6a7   : > { %6298 = vmatpush3.bf16.msra.mxu0 %v6719_v4 }
 0x6a8   : > { %6228 = vmatmul.mubr.msk.bf16.vlgmr.msra.gmra.mrb[72].mxu1 %vm4081_vm4, %v4041_v1 }
 0x6a9   : > { %6231 = vmatprep.mubr.msk.bf16.mxu1 %vm4081_vm4, %v4042_v12  ;;  %6236 = vmatpush3.bf16.msra.mxu1 %v6704_v7  ;;  %v6149_v19 = vpop.f32.mrb[204].mxu0 }
 0x6aa   : > { %6237 = vmatprep.subr.bf16.mxu1 %v6705_v18  ;;  %v3913_v20 = vpop.f32.mrb[205].mxu0 }
 0x6ab   : > { %v6150_v22 = vpop.f32.mrb[206].mxu0 }
 0x6ac   : > { %v4047_v23 = vpack.c.bf16 %v6150_v22, %v6149_v19  ;;  %v3916_v24 = vpop.f32.mrb[207].mxu0 }
 0x6ad   : > { %6238 = vmatpush3.bf16.msra.mxu1 %v6705_v18  ;;  %v4046_v25 = vpack.c.bf16 %v3916_v24, %v3913_v20 }
 0x6ae   : > { %6247 = vmatprep.subr.bf16.mxu1 %v6706_v21 }
 0x6b0   : > { %6232 = vmatmul.mubr.msk.bf16.gmra.mrb[76].mxu1 %vm4081_vm4, %v4043_v9 }
 0x6b1   : > { %6239 = vmatprep.mubr.msk.bf16.mxu1 %vm4081_vm4, %v4044_v17  ;;  %v6153_v26 = vpop.f32.mrb[208].mxu0 }
 0x6b2   : > { %v3929_v27 = vpop.f32.mrb[209].mxu0 }
 0x6b3   : > { %v6154_v28 = vpop.f32.mrb[210].mxu0 }
 0x6b4   : > { %v4049_v29 = vpack.c.bf16 %v6154_v28, %v6153_v26  ;;  %v3932_v56 = vpop.f32.mrb[211].mxu0 }
 0x6b5   : > { %v4048_v46 = vpack.c.bf16 %v3932_v56, %v3929_v27 }
 0x6b8   : > { %6240 = vmatmul.mubr.msk.bf16.vlgmr.msra.gmra.mrb[72].mxu1 %vm4081_vm4, %v4045_v15 }
 0x6b9   : > { %6243 = vmatprep.mubr.msk.bf16.mxu1 %vm4081_vm4, %v4046_v25  ;;  %6248 = vmatpush3.bf16.msra.mxu1 %v6706_v21  ;;  %v6157_v45 = vpop.f32.mrb[212].mxu0 }
 0x6ba   : > { %6249 = vmatprep.subr.bf16.mxu1 %v6707_v33  ;;  %v3945_v55 = vpop.f32.mrb[213].mxu0 }
 0x6bb   : > { %v6158_v41 = vpop.f32.mrb[214].mxu0 }
 0x6bc   : > { %v4051_v51 = vpack.c.bf16 %v6158_v41, %v6157_v45  ;;  %v3948_v38 = vpop.f32.mrb[215].mxu0 }
 0x6bd   : > { %6250 = vmatpush3.bf16.msra.mxu1 %v6707_v33  ;;  %v4050_v60 = vpack.c.bf16 %v3948_v38, %v3945_v55  ;;  %v5586_v55 = vld [vmem:[%s7774_s10] ss:$0 sm:$0xff] }
 0x6be   : > { %6259 = vmatprep.subr.bf16.mxu1 %v6708_v43 }
 0x6c0   : > { %6244 = vmatmul.mubr.msk.bf16.gmra.mrb[76].mxu1 %vm4081_vm4, %v4047_v23 }
 0x6c1   : > { %6251 = vmatprep.mubr.msk.bf16.mxu1 %vm4081_vm4, %v4048_v46  ;;  %v6161_v37 = vpop.f32.mrb[216].mxu0 }
 0x6c2   : > { %v3961_v35 = vpop.f32.mrb[217].mxu0 }
 0x6c3   : > { %v6162_v49 = vpop.f32.mrb[218].mxu0 }
 0x6c4   : > { %v4053_v39 = vpack.c.bf16 %v6162_v49, %v6161_v37  ;;  %v3964_v42 = vpop.f32.mrb[219].mxu0 }
 0x6c5   : > { %v4052_v36 = vpack.c.bf16 %v3964_v42, %v3961_v35 }
 0x6c8   : > { %6252 = vmatmul.mubr.msk.bf16.vlgmr.msra.gmra.mrb[72].mxu1 %vm4081_vm4, %v4049_v29 }
 0x6c9   : > { %6255 = vmatprep.mubr.msk.bf16.mxu1 %vm4081_vm4, %v4050_v60  ;;  %6260 = vmatpush3.bf16.msra.mxu1 %v6708_v43  ;;  %v6165_v40 = vpop.f32.mrb[220].mxu0 }
 0x6ca   : > { %6261 = vmatprep.subr.bf16.mxu1 %v6709_v30  ;;  %v3977_v59 = vpop.f32.mrb[221].mxu0 }
 0x6cb   : > { %v6166_v50 = vpop.f32.mrb[222].mxu0 }
 0x6cc   : > { %v4055_v48 = vpack.c.bf16 %v6166_v50, %v6165_v40  ;;  %v3980_v52 = vpop.f32.mrb[223].mxu0 }
 0x6cd   : > { %6262 = vmatpush3.bf16.msra.mxu1 %v6709_v30  ;;  %v4054_v54 = vpack.c.bf16 %v3980_v52, %v3977_v59 }
 0x6ce   : > { %6271 = vmatprep.subr.bf16.mxu1 %v6710_v61 }
 0x6d0   : > { %6256 = vmatmul.mubr.msk.bf16.gmra.mrb[76].mxu1 %vm4081_vm4, %v4051_v51 }
 0x6d1   : > { %6263 = vmatprep.mubr.msk.bf16.mxu1 %vm4081_vm4, %v4052_v36  ;;  %v6169_v47 = vpop.f32.mrb[224].mxu0 }
 0x6d2   : > { %v3993_v31 = vpop.f32.mrb[225].mxu0 }
 0x6d3   : > { %v6170_v57 = vpop.f32.mrb[226].mxu0 }
 0x6d4   : > { %v4057_v58 = vpack.c.bf16 %v6170_v57, %v6169_v47  ;;  %v3996_v53 = vpop.f32.mrb[227].mxu0 }
 0x6d5   : > { %v4056_v34 = vpack.c.bf16 %v3996_v53, %v3993_v31 }
 0x6d8   : > { %6264 = vmatmul.mubr.msk.bf16.vlgmr.msra.gmra.mrb[72].mxu1 %vm4081_vm4, %v4053_v39 }
 0x6d9   : > { %6267 = vmatprep.mubr.msk.bf16.mxu1 %vm4081_vm4, %v4054_v54  ;;  %6272 = vmatpush3.bf16.msra.mxu1 %v6710_v61  ;;  %v6173_v32 = vpop.f32.mrb[228].mxu0 }
 0x6da   : > { %6273 = vmatprep.subr.bf16.mxu1 %v6711_v44  ;;  %v4009_v62 = vpop.f32.mrb[229].mxu0 }
 0x6db   : > { %v6174_v63 = vpop.f32.mrb[230].mxu0 }
 0x6dc   : > { %v4059_v0 = vpack.c.bf16 %v6174_v63, %v6173_v32  ;;  %v4012_v1 = vpop.f32.mrb[231].mxu0 }
 0x6dd   : > { %6274 = vmatpush3.bf16.msra.mxu1 %v6711_v44  ;;  %v4058_v2 = vpack.c.bf16 %v4012_v1, %v4009_v62 }
 0x6e0   : > { %6268 = vmatmul.mubr.msk.bf16.gmra.mrb[76].mxu1 %vm4081_vm4, %v4055_v48 }
 0x6e1   : > { %6275 = vmatprep.mubr.msk.bf16.mxu1 %vm4081_vm4, %v4056_v34 }
 0x6e8   : > { %6276 = vmatmul.mubr.msk.bf16.vlgmr.msra.gmra.mrb[72].mxu1 %vm4081_vm4, %v4057_v58 }
 0x6e9   : > { %6279 = vmatprep.mubr.msk.bf16.mxu1 %vm4081_vm4, %v4058_v2 }
 0x6f0   : > { %6280 = vmatmul.mubr.msk.bf16.gmra.mrb[76].mxu1 %vm4081_vm4, %v4059_v0 }
 0x7bb   : > { %v6277_v6 = vpop.f32.mrb[72].mxu1 }
 0x7bc   : > { %v4970_v7 = vadd.f32 %v6277_v6, %v5585_v5  ;;  %v4923_v8 = vpop.f32.mrb[73].mxu1 }
 0x7bd   : > { %v4968_v9 = vadd.f32 %v5585_v5, %v4923_v8  ;;  %v6278_v10 = vpop.f32.mrb[74].mxu1 }
 0x7be   : > { %v4971_v12 = vadd.f32 %v6278_v10, %v5585_v5  ;;  %v4926_v13 = vpop.f32.mrb[75].mxu1  ;;  %v4978_v14 = vmax.f32 %v4970_v7, 0.0 }
 0x7bf   : > { %v4969_v11 = vadd.f32 %v5585_v5, %v4926_v13  ;;  %v4976_v16 = vmax.f32 %v4968_v9, 0.0 }
 0x7c0   : > { %v4979_v15 = vmax.f32 %v4971_v12, 0.0 }
 0x7c1   : > { %v4977_v17 = vmax.f32 %v4969_v11, 0.0 }
 0x7c2   : > { %v4985_v18 = vpack.c.bf16 %v4979_v15, %v4978_v14 }
 0x7c3   : > { %v4984_v19 = vpack.c.bf16 %v4977_v17, %v4976_v16  ;;  %v6281_v20 = vpop.f32.mrb[76].mxu1 }
 0x7c4   : > { %v4974_v21 = vadd.f32 %v6281_v20, %v5585_v5  ;;  %v4939_v22 = vpop.f32.mrb[77].mxu1 }
 0x7c5   : > { %v4972_v23 = vadd.f32 %v5585_v5, %v4939_v22  ;;  %v6282_v24 = vpop.f32.mrb[78].mxu1  ;;  %6299 = vmatprep.mubr.bf16.mxu0 %v4984_v19 }
 0x7c6   : > { %v4975_v25 = vadd.f32 %v6282_v24, %v5585_v5  ;;  %v4942_v26 = vpop.f32.mrb[79].mxu1  ;;  %6300 = vmatmul.mubr.bf16.vlgmr.msra.gmra.mrb[232].mxu0 %v4985_v18  ;;  %v4982_v28 = vmax.f32 %v4974_v21, 0.0 }
 0x7c7   : > { %v4973_v27 = vadd.f32 %v5585_v5, %v4942_v26  ;;  %v4980_v56 = vmax.f32 %v4972_v23, 0.0 }
 0x7c8   : > { %v4983_v29 = vmax.f32 %v4975_v25, 0.0 }
 0x7c9   : > { %v4981_v46 = vmax.f32 %v4973_v27, 0.0 }
 0x7ca   : > { %v4987_v33 = vpack.c.bf16 %v4983_v29, %v4982_v28 }
 0x7cb   : > { %v4986_v45 = vpack.c.bf16 %v4981_v46, %v4980_v56 }
 0x7cd   : > { %6303 = vmatprep.mubr.bf16.mxu0 %v4986_v45 }
 0x7ce   : > { %6304 = vmatmul.mubr.bf16.gmra.mrb[236].mxu0 %v4987_v33 }
 0x899   : > { %v6301_v43 = vpop.f32.mrb[232].mxu0 }
 0x89a   : > { %v5102_v41 = vadd.f32 %v6301_v43, %v5586_v55  ;;  %v5093_v51 = vpop.f32.mrb[233].mxu0 }
 0x89b   : > { %v5094_v38 = vadd.f32 %v5586_v55, %v5093_v51  ;;  %v6302_v60 = vpop.f32.mrb[234].mxu0 }
 0x89c   : > { %5126 = vst.msk [vmem:[%s386_s13 + $0x10] sm:$0xff] %vm1309_vm1, %v5102_v41  ;;  %v5105_v37 = vadd.f32 %v6302_v60, %v5586_v55  ;;  %v5096_v35 = vpop.f32.mrb[235].mxu0 }
 0x89d   : > { %5124 = vst.msk [vmem:[%s386_s13] sm:$0xff] %vm1309_vm1, %v5094_v38  ;;  %v5097_v49 = vadd.f32 %v5586_v55, %v5096_v35 }
 0x89e   : > { %5127 = vst.msk [vmem:[%s386_s13 + $0x18] sm:$0xff] %vm1309_vm1, %v5105_v37 }
 0x89f   : > { %5125 = vst.msk [vmem:[%s386_s13 + $0x8] sm:$0xff] %vm1309_vm1, %v5097_v49 }
 0x8a1   : > { %v6305_v39 = vpop.f32.mrb[236].mxu0 }
 0x8a2   : > { %v5118_v42 = vadd.f32 %v6305_v39, %v5586_v55  ;;  %v5109_v36 = vpop.f32.mrb[237].mxu0 }
 0x8a3   : > { %v5110_v30 = vadd.f32 %v5586_v55, %v5109_v36  ;;  %v6306_v40 = vpop.f32.mrb[238].mxu0 }
 0x8a4   : > { %5130 = vst.msk [vmem:[%s386_s13 + $0x30] sm:$0xff] %vm1309_vm1, %v5118_v42  ;;  %v5121_v59 = vadd.f32 %v6306_v40, %v5586_v55  ;;  %v5112_v61 = vpop.f32.mrb[239].mxu0 }
 0x8a5   : > { %5128 = vst.msk [vmem:[%s386_s13 + $0x20] sm:$0xff] %vm1309_vm1, %v5110_v30  ;;  %v5113_v50 = vadd.f32 %v5586_v55, %v5112_v61 }
 0x8a6   : > { %5131 = vst.msk [vmem:[%s386_s13 + $0x38] sm:$0xff] %vm1309_vm1, %v5121_v59 }
 0x8a7   : > { %5129 = vst.msk [vmem:[%s386_s13 + $0x28] sm:$0xff] %vm1309_vm1, %v5113_v50 }
 0x8a8 PF: > { %s21_s17 = sadd.s32 1, %s6726_s17  }
 0x8a9   : > { %p18_p4 = scmp.ge.s32.totalorder %s21_s17, 4  }
 0x8ab   :  { %20 = sbr.rel (!%p18_p4) target bundleno = 1 (0x1), region = 118 }

</bundles_post_ra>
